<compile_context>
chip_gen: v6e
topology: v6e:2x2x1
jax: 0.10.0
libtpu: 0.0.40
codegen_flags: <defaults>
</compile_context>

<pallas_src>
import math

import jax
import jax.numpy as jnp
from jax.experimental import pallas as pl
from jax.experimental.pallas import tpu as pltpu

INPUT_SIZE = 4
FREQ_BANDS = 8
HIDDEN = 32
ROW_PACK = 4                                   # rows packed along the lane axis
LN_EPS = 1e-5
TWO_PI = 2.0 * math.pi
HALF_PI = 0.5 * math.pi

L_X = ROW_PACK * INPUT_SIZE                    # 16   packed x lanes
L_PHI = ROW_PACK * INPUT_SIZE * FREQ_BANDS     # 256  packed phase lanes (cos half)
L_H1 = ROW_PACK * INPUT_SIZE * HIDDEN          # 512  packed per-feature hidden lanes
L_OUT = ROW_PACK * HIDDEN                      # 128  packed output lanes


def _gelu(x):
    # exact (erf-based) GELU, matching torch.nn.GELU() default
    return 0.5 * x * (1.0 + jax.lax.erf(x * (1.0 / math.sqrt(2.0))))


def _layer_norm(x, gamma, beta):
    mu = jnp.mean(x, axis=-1, keepdims=True)
    xc = x - mu
    var = jnp.mean(xc * xc, axis=-1, keepdims=True)
    inv = jax.lax.rsqrt(var + LN_EPS)
    return xc * inv * gamma + beta


def _group_layer_norm(x, avg_proj, avg_bcast, gamma, beta):
    """LayerNorm over each consecutive 32-lane group of the last axis.

    Group mean/variance are computed with two small matmuls (project to one
    value per group, broadcast back) so the reduction runs on the MXU instead
    of a cross-lane reduce.
    """
    mu = jnp.dot(jnp.dot(x, avg_proj, preferred_element_type=jnp.float32),
                 avg_bcast, preferred_element_type=jnp.float32)
    xc = x - mu
    var = jnp.dot(jnp.dot(xc * xc, avg_proj, preferred_element_type=jnp.float32),
                  avg_bcast, preferred_element_type=jnp.float32)
    inv = jax.lax.rsqrt(var + LN_EPS)
    return xc * inv * gamma + beta


def fourier_kernel(x_ref, d2_ref, poff_ref, wcs_ref, wx_ref, b1_ref, g1_ref, be1_ref,
                   a1_ref, c1_ref, w2_ref, b2_ref, g2_ref, be2_ref,
                   a2_ref, c2_ref, wo_ref, bo_ref, o_ref):
    x = x_ref[...].astype(jnp.float32)                       # [t, 16]

    # Fourier phases for 4 rows x 4 features at once; sin is folded in as
    # cos(phi - pi/2) so a single EUP cos covers both halves.
    phase = (jnp.dot(x, d2_ref[...], preferred_element_type=jnp.float32)
             + poff_ref[...])                                # [t, 512]
    cs = jnp.cos(phase)                                      # [cos(phi) | sin(phi)]

    # first Linear of every per-feature MLP (block-diagonal packed weights)
    h = (jnp.dot(cs, wcs_ref[...], preferred_element_type=jnp.float32)
         + jnp.dot(x, wx_ref[...], preferred_element_type=jnp.float32)
         + b1_ref[...])                                      # [t, 512]
    h = _group_layer_norm(h, a1_ref[...], c1_ref[...], g1_ref[...], be1_ref[...])
    h = _gelu(h)

    # second Linear; the sum over the 4 input features is folded into the
    # packed weight, so this already yields the summed embedding.  [t, 128]
    h = jnp.dot(h, w2_ref[...], preferred_element_type=jnp.float32) + b2_ref[...]

    # output head: LayerNorm -> GELU -> Linear (block-diagonal over row groups)
    y = _group_layer_norm(h, a2_ref[...], c2_ref[...], g2_ref[...], be2_ref[...])
    y = _gelu(y)
    y = jnp.dot(y, wo_ref[...], preferred_element_type=jnp.float32) + bo_ref[...]
    o_ref[...] = y.astype(o_ref.dtype)


def _group_avg_mats(width, group):
    n_groups = width // group
    lane_group = jnp.arange(width) // group
    proj = (lane_group[:, None] == jnp.arange(n_groups)[None, :]
            ).astype(jnp.float32) / group                    # [width, n_groups]
    bcast = (jnp.arange(n_groups)[:, None] == lane_group[None, :]
             ).astype(jnp.float32)                           # [n_groups, width]
    return proj, bcast


def pack_params(params):
    """Pack per-feature MLP weights into lane-packed block-diagonal matrices."""
    dense, w1, b1, g1, be1, w2, b2, g_out, be_out, w_out, b_out = params
    I, F, H, G = INPUT_SIZE, FREQ_BANDS, HIDDEN, ROW_PACK
    eye_i = jnp.eye(I, dtype=jnp.float32)
    eye_g = jnp.eye(G, dtype=jnp.float32)

    # phase projection: x [., 16] -> [cos-phase | sin-phase] lanes [., 512]
    d_single = (eye_i[:, :, None] * (TWO_PI * dense)[None, :, :]).reshape(I, I * F)
    d_pack = jnp.kron(eye_g, d_single)                        # [16, 256]
    d2 = jnp.concatenate([d_pack, d_pack], axis=1)            # [16, 512]
    poff = jnp.concatenate([jnp.zeros((1, L_PHI), jnp.float32),
                            jnp.full((1, L_PHI), -HALF_PI, jnp.float32)], axis=1)

    # first Linear (2F+1 -> H) split into cos / sin / x block-diagonal parts
    wc = (eye_i[:, None, :, None] * w1[:, 0:F, None, :]).reshape(I * F, I * H)
    ws = (eye_i[:, None, :, None] * w1[:, F:2 * F, None, :]).reshape(I * F, I * H)
    wcs = jnp.concatenate([jnp.kron(eye_g, wc), jnp.kron(eye_g, ws)], axis=0)  # [512, 512]
    wx = jnp.kron(eye_g, (eye_i[:, :, None] * w1[:, None, 2 * F, :]).reshape(I, I * H))  # [16, 512]
    b1p = jnp.tile(b1.reshape(1, I * H), (1, G))
    g1p = jnp.tile(g1.reshape(1, I * H), (1, G))
    be1p = jnp.tile(be1.reshape(1, I * H), (1, G))

    # second Linear; stacking the 4 per-feature blocks vertically folds the
    # sum over input features into the matmul.                 [512, 128]
    w2p = jnp.kron(eye_g, w2.reshape(I * H, H))
    b2p = jnp.tile(jnp.sum(b2, axis=0).reshape(1, H), (1, G))

    # output head (same weights replicated for the 4 packed rows)
    g2p = jnp.tile(g_out.reshape(1, H), (1, G))
    be2p = jnp.tile(be_out.reshape(1, H), (1, G))
    wop = jnp.kron(eye_g, w_out)                              # [128, 128]
    bop = jnp.tile(b_out.reshape(1, H), (1, G))

    a1, c1 = _group_avg_mats(L_H1, H)                         # [512,16], [16,512]
    a2, c2 = _group_avg_mats(L_OUT, H)                        # [128, 4], [ 4,128]

    return (d2, poff, wcs, wx, b1p, g1p, be1p, a1, c1,
            w2p, b2p, g2p, be2p, a2, c2, wop, bop)


def _round_up(a, m):
    return ((a + m - 1) // m) * m


def fourier_embedding2(x, params, *, tile_rows=2048):
    """x: [b, polygons, points, input_size] -> [b, polygons, points, hidden]."""
    b, P, pts, isz = x.shape
    assert isz == INPUT_SIZE
    N = b * P * pts

    row_align = 8 * ROW_PACK                                  # keeps sublane dim % 8
    tile_rows = max(row_align, min(_round_up(tile_rows, row_align),
                                   _round_up(N, row_align)))
    n_pad = _round_up(N, tile_rows)
    tile_slab = tile_rows // ROW_PACK
    m_total = n_pad // ROW_PACK

    x_flat = x.reshape(N, isz)
    if n_pad != N:
        pad = jnp.zeros((n_pad - N, isz), x_flat.dtype)
        x_flat = jnp.concatenate([x_flat, pad], axis=0)
    x_slab = x_flat.reshape(m_total, ROW_PACK * isz)          # 4 rows packed per slab row

    packed = pack_params(params)
    grid = (m_total // tile_slab,)

    full = lambda a: pl.BlockSpec(a.shape, lambda n: (0, 0))
    in_specs = [pl.BlockSpec((tile_slab, ROW_PACK * isz), lambda n: (n, 0))]
    in_specs += [full(w) for w in packed]
    out_spec = pl.BlockSpec((tile_slab, L_OUT), lambda n: (n, 0))

    weight_bytes = sum(int(w.size) * 4 for w in packed)
    cost = pl.CostEstimate(
        flops=800_000 * m_total,
        transcendentals=1_172 * m_total,
        bytes_accessed=(ROW_PACK * isz + L_OUT) * 4 * m_total + weight_bytes)

    out_slab = pl.pallas_call(
        fourier_kernel,
        out_shape=jax.ShapeDtypeStruct((m_total, L_OUT), jnp.float32),
        grid_spec=pltpu.PrefetchScalarGridSpec(
            num_scalar_prefetch=0,
            grid=grid,
            in_specs=in_specs,
            out_specs=out_spec),
        compiler_params=pltpu.CompilerParams(
            dimension_semantics=("parallel",),
            vmem_limit_bytes=32 * 1024 * 1024),
        cost_estimate=cost,
    )(x_slab, *packed)

    out = out_slab.reshape(n_pad, HIDDEN)[:N]
    return out.reshape(b, P, pts, HIDDEN)


def init_params(key):
    ks = jax.random.split(key, 11)
    f2p1 = 2 * FREQ_BANDS + 1
    dense = jax.random.normal(ks[0], (INPUT_SIZE, FREQ_BANDS), jnp.float32)
    w1 = jax.random.normal(ks[1], (INPUT_SIZE, f2p1, HIDDEN), jnp.float32) * (1.0 / math.sqrt(f2p1))
    b1 = jax.random.normal(ks[2], (INPUT_SIZE, HIDDEN), jnp.float32) * 0.01
    g1 = jnp.ones((INPUT_SIZE, HIDDEN), jnp.float32)
    be1 = jnp.zeros((INPUT_SIZE, HIDDEN), jnp.float32)
    w2 = jax.random.normal(ks[3], (INPUT_SIZE, HIDDEN, HIDDEN), jnp.float32) * (1.0 / math.sqrt(HIDDEN))
    b2 = jax.random.normal(ks[4], (INPUT_SIZE, HIDDEN), jnp.float32) * 0.01
    g_out = jnp.ones((1, HIDDEN), jnp.float32)
    be_out = jnp.zeros((1, HIDDEN), jnp.float32)
    w_out = jax.random.normal(ks[5], (HIDDEN, HIDDEN), jnp.float32) * (1.0 / math.sqrt(HIDDEN))
    b_out = jax.random.normal(ks[6], (1, HIDDEN), jnp.float32) * 0.01
    return (dense, w1, b1, g1, be1, w2, b2, g_out, be_out, w_out, b_out)


def reference(x, params):
    """Pure-JAX reference mirroring the PyTorch forward."""
    (dense, w1, b1, g1, be1, w2, b2, g_out, be_out, w_out, b_out) = params
    phi = jnp.einsum('ijkl,lh->ijklh', x, dense) * TWO_PI
    feat = jnp.concatenate([jnp.cos(phi), jnp.sin(phi), x[..., None]], axis=-1)
    outs = []
    for i in range(INPUT_SIZE):
        h = feat[..., i, :] @ w1[i] + b1[i]
        h = _layer_norm(h, g1[i], be1[i])
        h = _gelu(h)
        h = h @ w2[i] + b2[i]
        outs.append(h)
    s = sum(outs)
    y = _layer_norm(s, g_out[0], be_out[0])
    y = _gelu(y)
    return y @ w_out + b_out[0]


if __name__ == "__main__":
    key = jax.random.PRNGKey(0)
    kx, kp = jax.random.split(key)
    b, polygons, points = 2, 4, 8
    x = jax.random.normal(kx, (b, polygons, points, INPUT_SIZE), jnp.float32)
    params = init_params(kp)

    out = fourier_embedding2(x, params)
    out = jax.block_until_ready(out)

    ref = reference(x, params)
    assert out.shape == (b, polygons, points, HIDDEN)
    err = float(jnp.max(jnp.abs(out - ref)))
    assert err < 1e-3, err
    print("KERNEL_OK")
</pallas_src>

<mosaic_0001>
module attributes {stable_mosaic.version = 11 : i64} {
  func.func @fourier_kernel(%arg0: i32, %arg1: memref<16x16xf32, #tpu.memory_space<vmem>>, %arg2: memref<16x256xf32, #tpu.memory_space<vmem>>, %arg3: memref<1x256xf32, #tpu.memory_space<vmem>>, %arg4: memref<256x512xf32, #tpu.memory_space<vmem>>, %arg5: memref<16x512xf32, #tpu.memory_space<vmem>>, %arg6: memref<1x512xf32, #tpu.memory_space<vmem>>, %arg7: memref<1x512xf32, #tpu.memory_space<vmem>>, %arg8: memref<1x512xf32, #tpu.memory_space<vmem>>, %arg9: memref<512x16xf32, #tpu.memory_space<vmem>>, %arg10: memref<16x512xf32, #tpu.memory_space<vmem>>, %arg11: memref<512x128xf32, #tpu.memory_space<vmem>>, %arg12: memref<1x128xf32, #tpu.memory_space<vmem>>, %arg13: memref<1x128xf32, #tpu.memory_space<vmem>>, %arg14: memref<1x128xf32, #tpu.memory_space<vmem>>, %arg15: memref<128x4xf32, #tpu.memory_space<vmem>>, %arg16: memref<4x128xf32, #tpu.memory_space<vmem>>, %arg17: memref<128x128xf32, #tpu.memory_space<vmem>>, %arg18: memref<1x128xf32, #tpu.memory_space<vmem>>, %arg19: memref<16x128xf32, #tpu.memory_space<vmem>>) attributes {dimension_semantics = [#tpu.dimension_semantics<parallel>], iteration_bounds = array<i64: 1>, scalar_prefetch = 0 : i64, scratch_operands = 0 : i64, tpu.core_type = #tpu.core_type<tc>, window_params = [{transform_indices = @transform_0, window_bounds = array<i64: 16, 16>}, {pipeline_mode = #tpu.pipeline_mode<synchronous>, transform_indices = @transform_1, window_bounds = array<i64: 16, 256>}, {pipeline_mode = #tpu.pipeline_mode<synchronous>, transform_indices = @transform_2, window_bounds = array<i64: 1, 256>}, {pipeline_mode = #tpu.pipeline_mode<synchronous>, transform_indices = @transform_3, window_bounds = array<i64: 256, 512>}, {pipeline_mode = #tpu.pipeline_mode<synchronous>, transform_indices = @transform_4, window_bounds = array<i64: 16, 512>}, {pipeline_mode = #tpu.pipeline_mode<synchronous>, transform_indices = @transform_5, window_bounds = array<i64: 1, 512>}, {pipeline_mode = #tpu.pipeline_mode<synchronous>, transform_indices = @transform_6, window_bounds = array<i64: 1, 512>}, {pipeline_mode = #tpu.pipeline_mode<synchronous>, transform_indices = @transform_7, window_bounds = array<i64: 1, 512>}, {pipeline_mode = #tpu.pipeline_mode<synchronous>, transform_indices = @transform_8, window_bounds = array<i64: 512, 16>}, {pipeline_mode = #tpu.pipeline_mode<synchronous>, transform_indices = @transform_9, window_bounds = array<i64: 16, 512>}, {pipeline_mode = #tpu.pipeline_mode<synchronous>, transform_indices = @transform_10, window_bounds = array<i64: 512, 128>}, {pipeline_mode = #tpu.pipeline_mode<synchronous>, transform_indices = @transform_11, window_bounds = array<i64: 1, 128>}, {pipeline_mode = #tpu.pipeline_mode<synchronous>, transform_indices = @transform_12, window_bounds = array<i64: 1, 128>}, {pipeline_mode = #tpu.pipeline_mode<synchronous>, transform_indices = @transform_13, window_bounds = array<i64: 1, 128>}, {pipeline_mode = #tpu.pipeline_mode<synchronous>, transform_indices = @transform_14, window_bounds = array<i64: 128, 4>}, {pipeline_mode = #tpu.pipeline_mode<synchronous>, transform_indices = @transform_15, window_bounds = array<i64: 4, 128>}, {pipeline_mode = #tpu.pipeline_mode<synchronous>, transform_indices = @transform_16, window_bounds = array<i64: 128, 128>}, {pipeline_mode = #tpu.pipeline_mode<synchronous>, transform_indices = @transform_17, window_bounds = array<i64: 1, 128>}, {transform_indices = @transform_18, window_bounds = array<i64: 16, 128>}]} {
    %c0 = arith.constant 0 : index
    %c0_0 = arith.constant 0 : index
    %0 = vector.load %arg1[%c0, %c0_0] : memref<16x16xf32, #tpu.memory_space<vmem>>, vector<16x16xf32>
    %c0_1 = arith.constant 0 : index
    %c0_2 = arith.constant 0 : index
    %1 = vector.load %arg2[%c0_1, %c0_2] : memref<16x256xf32, #tpu.memory_space<vmem>>, vector<16x256xf32>
    %cst = arith.constant dense<0.000000e+00> : vector<16x256xf32>
    %2 = tpu.matmul %0, %1, %cst {dimension_numbers = #tpu.dot_dimension_numbers<[1], [0], [0], [1], [0, 0, 1, 1], [], []>} : vector<16x16xf32>, vector<16x256xf32>, vector<16x256xf32> -> vector<16x256xf32>
    %c0_3 = arith.constant 0 : index
    %c0_4 = arith.constant 0 : index
    %3 = vector.load %arg3[%c0_3, %c0_4] : memref<1x256xf32, #tpu.memory_space<vmem>>, vector<1x256xf32>
    %4 = vector.broadcast %3 : vector<1x256xf32> to vector<16x256xf32>
    %5 = arith.addf %2, %4 : vector<16x256xf32>
    %6 = math.cos %5 : vector<16x256xf32>
    %c0_5 = arith.constant 0 : index
    %c0_6 = arith.constant 0 : index
    %7 = vector.load %arg4[%c0_5, %c0_6] : memref<256x512xf32, #tpu.memory_space<vmem>>, vector<256x512xf32>
    %cst_7 = arith.constant dense<0.000000e+00> : vector<16x512xf32>
    %8 = tpu.matmul %6, %7, %cst_7 {dimension_numbers = #tpu.dot_dimension_numbers<[1], [0], [0], [1], [0, 0, 1, 1], [], []>} : vector<16x256xf32>, vector<256x512xf32>, vector<16x512xf32> -> vector<16x512xf32>
    %c0_8 = arith.constant 0 : index
    %c0_9 = arith.constant 0 : index
    %9 = vector.load %arg5[%c0_8, %c0_9] : memref<16x512xf32, #tpu.memory_space<vmem>>, vector<16x512xf32>
    %cst_10 = arith.constant dense<0.000000e+00> : vector<16x512xf32>
    %10 = tpu.matmul %0, %9, %cst_10 {dimension_numbers = #tpu.dot_dimension_numbers<[1], [0], [0], [1], [0, 0, 1, 1], [], []>} : vector<16x16xf32>, vector<16x512xf32>, vector<16x512xf32> -> vector<16x512xf32>
    %11 = arith.addf %8, %10 : vector<16x512xf32>
    %c0_11 = arith.constant 0 : index
    %c0_12 = arith.constant 0 : index
    %12 = vector.load %arg6[%c0_11, %c0_12] : memref<1x512xf32, #tpu.memory_space<vmem>>, vector<1x512xf32>
    %13 = vector.broadcast %12 : vector<1x512xf32> to vector<16x512xf32>
    %14 = arith.addf %11, %13 : vector<16x512xf32>
    %c0_13 = arith.constant 0 : index
    %c0_14 = arith.constant 0 : index
    %15 = vector.load %arg9[%c0_13, %c0_14] : memref<512x16xf32, #tpu.memory_space<vmem>>, vector<512x16xf32>
    %c0_15 = arith.constant 0 : index
    %c0_16 = arith.constant 0 : index
    %16 = vector.load %arg10[%c0_15, %c0_16] : memref<16x512xf32, #tpu.memory_space<vmem>>, vector<16x512xf32>
    %c0_17 = arith.constant 0 : index
    %c0_18 = arith.constant 0 : index
    %17 = vector.load %arg7[%c0_17, %c0_18] : memref<1x512xf32, #tpu.memory_space<vmem>>, vector<1x512xf32>
    %c0_19 = arith.constant 0 : index
    %c0_20 = arith.constant 0 : index
    %18 = vector.load %arg8[%c0_19, %c0_20] : memref<1x512xf32, #tpu.memory_space<vmem>>, vector<1x512xf32>
    %cst_21 = arith.constant dense<0.000000e+00> : vector<16x16xf32>
    %19 = tpu.matmul %14, %15, %cst_21 {dimension_numbers = #tpu.dot_dimension_numbers<[1], [0], [0], [1], [0, 0, 1, 1], [], []>} : vector<16x512xf32>, vector<512x16xf32>, vector<16x16xf32> -> vector<16x16xf32>
    %cst_22 = arith.constant dense<0.000000e+00> : vector<16x512xf32>
    %20 = tpu.matmul %19, %16, %cst_22 {dimension_numbers = #tpu.dot_dimension_numbers<[1], [0], [0], [1], [0, 0, 1, 1], [], []>} : vector<16x16xf32>, vector<16x512xf32>, vector<16x512xf32> -> vector<16x512xf32>
    %21 = arith.subf %14, %20 : vector<16x512xf32>
    %22 = arith.mulf %21, %21 : vector<16x512xf32>
    %cst_23 = arith.constant dense<0.000000e+00> : vector<16x16xf32>
    %23 = tpu.matmul %22, %15, %cst_23 {dimension_numbers = #tpu.dot_dimension_numbers<[1], [0], [0], [1], [0, 0, 1, 1], [], []>} : vector<16x512xf32>, vector<512x16xf32>, vector<16x16xf32> -> vector<16x16xf32>
    %cst_24 = arith.constant dense<0.000000e+00> : vector<16x512xf32>
    %24 = tpu.matmul %23, %16, %cst_24 {dimension_numbers = #tpu.dot_dimension_numbers<[1], [0], [0], [1], [0, 0, 1, 1], [], []>} : vector<16x16xf32>, vector<16x512xf32>, vector<16x512xf32> -> vector<16x512xf32>
    %cst_25 = arith.constant 9.99999974E-6 : f32
    %25 = vector.broadcast %cst_25 : f32 to vector<16x512xf32>
    %26 = arith.addf %24, %25 : vector<16x512xf32>
    %27 = math.rsqrt %26 : vector<16x512xf32>
    %28 = arith.mulf %21, %27 : vector<16x512xf32>
    %29 = vector.broadcast %17 : vector<1x512xf32> to vector<16x512xf32>
    %30 = arith.mulf %28, %29 : vector<16x512xf32>
    %31 = vector.broadcast %18 : vector<1x512xf32> to vector<16x512xf32>
    %32 = arith.addf %30, %31 : vector<16x512xf32>
    %cst_26 = arith.constant 5.000000e-01 : f32
    %33 = vector.broadcast %cst_26 : f32 to vector<16x512xf32>
    %34 = arith.mulf %33, %32 : vector<16x512xf32>
    %cst_27 = arith.constant 0.707106769 : f32
    %35 = vector.broadcast %cst_27 : f32 to vector<16x512xf32>
    %36 = arith.mulf %32, %35 : vector<16x512xf32>
    %37 = math.erf %36 : vector<16x512xf32>
    %cst_28 = arith.constant 1.000000e+00 : f32
    %38 = vector.broadcast %cst_28 : f32 to vector<16x512xf32>
    %39 = arith.addf %38, %37 : vector<16x512xf32>
    %40 = arith.mulf %34, %39 : vector<16x512xf32>
    %c0_29 = arith.constant 0 : index
    %c0_30 = arith.constant 0 : index
    %41 = vector.load %arg11[%c0_29, %c0_30] : memref<512x128xf32, #tpu.memory_space<vmem>>, vector<512x128xf32>
    %cst_31 = arith.constant dense<0.000000e+00> : vector<16x128xf32>
    %42 = tpu.matmul %40, %41, %cst_31 {dimension_numbers = #tpu.dot_dimension_numbers<[1], [0], [0], [1], [0, 0, 1, 1], [], []>} : vector<16x512xf32>, vector<512x128xf32>, vector<16x128xf32> -> vector<16x128xf32>
    %c0_32 = arith.constant 0 : index
    %c0_33 = arith.constant 0 : index
    %43 = vector.load %arg12[%c0_32, %c0_33] : memref<1x128xf32, #tpu.memory_space<vmem>>, vector<1x128xf32>
    %44 = vector.broadcast %43 : vector<1x128xf32> to vector<16x128xf32>
    %45 = arith.addf %42, %44 : vector<16x128xf32>
    %c0_34 = arith.constant 0 : index
    %c0_35 = arith.constant 0 : index
    %46 = vector.load %arg15[%c0_34, %c0_35] : memref<128x4xf32, #tpu.memory_space<vmem>>, vector<128x4xf32>
    %c0_36 = arith.constant 0 : index
    %c0_37 = arith.constant 0 : index
    %47 = vector.load %arg16[%c0_36, %c0_37] : memref<4x128xf32, #tpu.memory_space<vmem>>, vector<4x128xf32>
    %c0_38 = arith.constant 0 : index
    %c0_39 = arith.constant 0 : index
    %48 = vector.load %arg13[%c0_38, %c0_39] : memref<1x128xf32, #tpu.memory_space<vmem>>, vector<1x128xf32>
    %c0_40 = arith.constant 0 : index
    %c0_41 = arith.constant 0 : index
    %49 = vector.load %arg14[%c0_40, %c0_41] : memref<1x128xf32, #tpu.memory_space<vmem>>, vector<1x128xf32>
    %cst_42 = arith.constant dense<0.000000e+00> : vector<16x4xf32>
    %50 = tpu.matmul %45, %46, %cst_42 {dimension_numbers = #tpu.dot_dimension_numbers<[1], [0], [0], [1], [0, 0, 1, 1], [], []>} : vector<16x128xf32>, vector<128x4xf32>, vector<16x4xf32> -> vector<16x4xf32>
    %cst_43 = arith.constant dense<0.000000e+00> : vector<16x128xf32>
    %51 = tpu.matmul %50, %47, %cst_43 {dimension_numbers = #tpu.dot_dimension_numbers<[1], [0], [0], [1], [0, 0, 1, 1], [], []>} : vector<16x4xf32>, vector<4x128xf32>, vector<16x128xf32> -> vector<16x128xf32>
    %52 = arith.subf %45, %51 : vector<16x128xf32>
    %53 = arith.mulf %52, %52 : vector<16x128xf32>
    %cst_44 = arith.constant dense<0.000000e+00> : vector<16x4xf32>
    %54 = tpu.matmul %53, %46, %cst_44 {dimension_numbers = #tpu.dot_dimension_numbers<[1], [0], [0], [1], [0, 0, 1, 1], [], []>} : vector<16x128xf32>, vector<128x4xf32>, vector<16x4xf32> -> vector<16x4xf32>
    %cst_45 = arith.constant dense<0.000000e+00> : vector<16x128xf32>
    %55 = tpu.matmul %54, %47, %cst_45 {dimension_numbers = #tpu.dot_dimension_numbers<[1], [0], [0], [1], [0, 0, 1, 1], [], []>} : vector<16x4xf32>, vector<4x128xf32>, vector<16x128xf32> -> vector<16x128xf32>
    %cst_46 = arith.constant 9.99999974E-6 : f32
    %56 = vector.broadcast %cst_46 : f32 to vector<16x128xf32>
    %57 = arith.addf %55, %56 : vector<16x128xf32>
    %58 = math.rsqrt %57 : vector<16x128xf32>
    %59 = arith.mulf %52, %58 : vector<16x128xf32>
    %60 = vector.broadcast %48 : vector<1x128xf32> to vector<16x128xf32>
    %61 = arith.mulf %59, %60 : vector<16x128xf32>
    %62 = vector.broadcast %49 : vector<1x128xf32> to vector<16x128xf32>
    %63 = arith.addf %61, %62 : vector<16x128xf32>
    %cst_47 = arith.constant 5.000000e-01 : f32
    %64 = vector.broadcast %cst_47 : f32 to vector<16x128xf32>
    %65 = arith.mulf %64, %63 : vector<16x128xf32>
    %cst_48 = arith.constant 0.707106769 : f32
    %66 = vector.broadcast %cst_48 : f32 to vector<16x128xf32>
    %67 = arith.mulf %63, %66 : vector<16x128xf32>
    %68 = math.erf %67 : vector<16x128xf32>
    %cst_49 = arith.constant 1.000000e+00 : f32
    %69 = vector.broadcast %cst_49 : f32 to vector<16x128xf32>
    %70 = arith.addf %69, %68 : vector<16x128xf32>
    %71 = arith.mulf %65, %70 : vector<16x128xf32>
    %c0_50 = arith.constant 0 : index
    %c0_51 = arith.constant 0 : index
    %72 = vector.load %arg17[%c0_50, %c0_51] : memref<128x128xf32, #tpu.memory_space<vmem>>, vector<128x128xf32>
    %cst_52 = arith.constant dense<0.000000e+00> : vector<16x128xf32>
    %73 = tpu.matmul %71, %72, %cst_52 {dimension_numbers = #tpu.dot_dimension_numbers<[1], [0], [0], [1], [0, 0, 1, 1], [], []>} : vector<16x128xf32>, vector<128x128xf32>, vector<16x128xf32> -> vector<16x128xf32>
    %c0_53 = arith.constant 0 : index
    %c0_54 = arith.constant 0 : index
    %74 = vector.load %arg18[%c0_53, %c0_54] : memref<1x128xf32, #tpu.memory_space<vmem>>, vector<1x128xf32>
    %75 = vector.broadcast %74 : vector<1x128xf32> to vector<16x128xf32>
    %76 = arith.addf %73, %75 : vector<16x128xf32>
    %c0_55 = arith.constant 0 : index
    %c0_56 = arith.constant 0 : index
    %77 = vector.load %arg19[%c0_55, %c0_56] : memref<16x128xf32, #tpu.memory_space<vmem>>, vector<16x128xf32>
    tpu.vector_store %arg19[%c0_55, %c0_56], %76 {strides = array<i32>} : memref<16x128xf32, #tpu.memory_space<vmem>>, vector<16x128xf32>,
    return
  }
  func.func @transform_0(%arg0: i32) -> (i32, i32) {
    %c0_i32 = arith.constant 0 : i32
    %c0_i32_0 = arith.constant 0 : i32
    return %arg0, %c0_i32 : i32, i32
  }
  func.func @transform_1(%arg0: i32) -> (i32, i32) {
    %c0_i32 = arith.constant 0 : i32
    %c0_i32_0 = arith.constant 0 : i32
    %c0_i32_1 = arith.constant 0 : i32
    return %c0_i32, %c0_i32_0 : i32, i32
  }
  func.func @transform_2(%arg0: i32) -> (i32, i32) {
    %c0_i32 = arith.constant 0 : i32
    %c0_i32_0 = arith.constant 0 : i32
    %c0_i32_1 = arith.constant 0 : i32
    return %c0_i32, %c0_i32_0 : i32, i32
  }
  func.func @transform_3(%arg0: i32) -> (i32, i32) {
    %c0_i32 = arith.constant 0 : i32
    %c0_i32_0 = arith.constant 0 : i32
    %c0_i32_1 = arith.constant 0 : i32
    return %c0_i32, %c0_i32_0 : i32, i32
  }
  func.func @transform_4(%arg0: i32) -> (i32, i32) {
    %c0_i32 = arith.constant 0 : i32
    %c0_i32_0 = arith.constant 0 : i32
    %c0_i32_1 = arith.constant 0 : i32
    return %c0_i32, %c0_i32_0 : i32, i32
  }
  func.func @transform_5(%arg0: i32) -> (i32, i32) {
    %c0_i32 = arith.constant 0 : i32
    %c0_i32_0 = arith.constant 0 : i32
    %c0_i32_1 = arith.constant 0 : i32
    return %c0_i32, %c0_i32_0 : i32, i32
  }
  func.func @transform_6(%arg0: i32) -> (i32, i32) {
    %c0_i32 = arith.constant 0 : i32
    %c0_i32_0 = arith.constant 0 : i32
    %c0_i32_1 = arith.constant 0 : i32
    return %c0_i32, %c0_i32_0 : i32, i32
  }
  func.func @transform_7(%arg0: i32) -> (i32, i32) {
    %c0_i32 = arith.constant 0 : i32
    %c0_i32_0 = arith.constant 0 : i32
    %c0_i32_1 = arith.constant 0 : i32
    return %c0_i32, %c0_i32_0 : i32, i32
  }
  func.func @transform_8(%arg0: i32) -> (i32, i32) {
    %c0_i32 = arith.constant 0 : i32
    %c0_i32_0 = arith.constant 0 : i32
    %c0_i32_1 = arith.constant 0 : i32
    return %c0_i32, %c0_i32_0 : i32, i32
  }
  func.func @transform_9(%arg0: i32) -> (i32, i32) {
    %c0_i32 = arith.constant 0 : i32
    %c0_i32_0 = arith.constant 0 : i32
    %c0_i32_1 = arith.constant 0 : i32
    return %c0_i32, %c0_i32_0 : i32, i32
  }
  func.func @transform_10(%arg0: i32) -> (i32, i32) {
    %c0_i32 = arith.constant 0 : i32
    %c0_i32_0 = arith.constant 0 : i32
    %c0_i32_1 = arith.constant 0 : i32
    return %c0_i32, %c0_i32_0 : i32, i32
  }
  func.func @transform_11(%arg0: i32) -> (i32, i32) {
    %c0_i32 = arith.constant 0 : i32
    %c0_i32_0 = arith.constant 0 : i32
    %c0_i32_1 = arith.constant 0 : i32
    return %c0_i32, %c0_i32_0 : i32, i32
  }
  func.func @transform_12(%arg0: i32) -> (i32, i32) {
    %c0_i32 = arith.constant 0 : i32
    %c0_i32_0 = arith.constant 0 : i32
    %c0_i32_1 = arith.constant 0 : i32
    return %c0_i32, %c0_i32_0 : i32, i32
  }
  func.func @transform_13(%arg0: i32) -> (i32, i32) {
    %c0_i32 = arith.constant 0 : i32
    %c0_i32_0 = arith.constant 0 : i32
    %c0_i32_1 = arith.constant 0 : i32
    return %c0_i32, %c0_i32_0 : i32, i32
  }
  func.func @transform_14(%arg0: i32) -> (i32, i32) {
    %c0_i32 = arith.constant 0 : i32
    %c0_i32_0 = arith.constant 0 : i32
    %c0_i32_1 = arith.constant 0 : i32
    return %c0_i32, %c0_i32_0 : i32, i32
  }
  func.func @transform_15(%arg0: i32) -> (i32, i32) {
    %c0_i32 = arith.constant 0 : i32
    %c0_i32_0 = arith.constant 0 : i32
    %c0_i32_1 = arith.constant 0 : i32
    return %c0_i32, %c0_i32_0 : i32, i32
  }
  func.func @transform_16(%arg0: i32) -> (i32, i32) {
    %c0_i32 = arith.constant 0 : i32
    %c0_i32_0 = arith.constant 0 : i32
    %c0_i32_1 = arith.constant 0 : i32
    return %c0_i32, %c0_i32_0 : i32, i32
  }
  func.func @transform_17(%arg0: i32) -> (i32, i32) {
    %c0_i32 = arith.constant 0 : i32
    %c0_i32_0 = arith.constant 0 : i32
    %c0_i32_1 = arith.constant 0 : i32
    return %c0_i32, %c0_i32_0 : i32, i32
  }
  func.func @transform_18(%arg0: i32) -> (i32, i32) {
    %c0_i32 = arith.constant 0 : i32
    %c0_i32_0 = arith.constant 0 : i32
    return %arg0, %c0_i32 : i32, i32
  }
}

</mosaic_0001>

<bundles_post_ra>
// kernel: tpu_custom_call.1
= control target key start
LH: loop header
LB: loop body
LE: loop exit
PB: predicated region body
PF: predicated region fallthrough
CT: control target
= control target key end

     0   :  { %s4956_s0 = inlined_call_operand.vmem [shape: f32[16,16], index: 0, kind: input, shape index: {}]   ;;  %s4957_s1 = inlined_call_operand.hbm [shape: f32[16,256], index: 1, kind: input, shape index: {}]   ;;  %s4958_s2 = inlined_call_operand.hbm [shape: f32[1,256], index: 2, kind: input, shape index: {}]   ;;  %s4959_s3 = inlined_call_operand.hbm [shape: f32[256,512], index: 3, kind: input, shape index: {}]   ;;  %s4960_s4 = inlined_call_operand.vmem [shape: f32[16,512], index: 4, kind: input, shape index: {}]   ;;  %s4961_s5 = inlined_call_operand.vmem [shape: f32[1,512], index: 5, kind: input, shape index: {}]   ;;  %s4962_s6 = inlined_call_operand.hbm [shape: f32[1,512], index: 6, kind: input, shape index: {}]   ;;  %s4963_s7 = inlined_call_operand.hbm [shape: f32[1,512], index: 7, kind: input, shape index: {}]   ;;  %s4964_s8 = inlined_call_operand.vmem [shape: f32[512,16], index: 8, kind: input, shape index: {}]   ;;  %s4965_s9 = inlined_call_operand.hbm [shape: f32[16,512], index: 9, kind: input, shape index: {}]   ;;  %s4966_s10 = inlined_call_operand.vmem [shape: f32[512,128], index: 10, kind: input, shape index: {}]   ;;  %s4967_s11 = inlined_call_operand.hbm [shape: f32[1,128], index: 11, kind: input, shape index: {}]   ;;  %s4968_s12 = inlined_call_operand.vmem [shape: f32[1,128], index: 12, kind: input, shape index: {}]   ;;  %s4969_s13 = inlined_call_operand.hbm [shape: f32[1,128], index: 13, kind: input, shape index: {}]   ;;  %s4970_s14 = inlined_call_operand.vmem [shape: f32[128,4], index: 14, kind: input, shape index: {}]   ;;  %s4971_s15 = inlined_call_operand.vmem [shape: f32[4,128], index: 15, kind: input, shape index: {}]   ;;  %s4972_s16 = inlined_call_operand.vmem [shape: f32[128,128], index: 16, kind: input, shape index: {}]   ;;  %s4973_s17 = inlined_call_operand.vmem [shape: f32[1,128], index: 17, kind: input, shape index: {}]   ;;  %s4974_s18 = inlined_call_operand.hbm [shape: f32[16,128], index: 18, kind: output, shape index: {}]  }
   0x1   :  { %5008 = sst [smem:[#allocation52_spill]] %s4956_s0 }
   0x2   :  { %5009 = sst [smem:[#allocation53_spill]] %s4957_s1 }
   0x3   :  { %5010 = sst [smem:[#allocation54_spill]] %s4958_s2 }
   0x4   :  { %23 = vsyncpa [#allocation3], 0 }
   0x5   :  { %24 = vsyncpa [#allocation6], 0 }
   0x6   :  { %25 = vsyncpa [#allocation9], 0 }
   0x7   :  { %26 = vsyncpa [#allocation12], 0 }
   0x8   :  { %27 = vsyncpa [#allocation15], 0 }
   0x9   :  { %28 = vsyncpa [#allocation4], 0  ;;  %s3414_s27 = smov [#allocation5]   ;;  %s3415_s29 = smov [#allocation8]  }
   0xa   :  { %s49_s28 = sshll.u32 %s3414_s27, 4  ;;  %s75_s30 = sshll.u32 %s3415_s29, 4  ;;  %s50_s28 = int_to_ptr.vmem [resolvable:$true] %s49_s28  ;;  %s76_s30 = int_to_ptr.vmem [resolvable:$true] %s75_s30 }
   0xb   :  { %s3230_s0 = scalar_lea.vmem %s50_s28, 32  ;;  %p3235_p1 = scmp.lt.s32.totalorder %s50_s28, %s50_s28 }
   0xc   :  { %p3231_p0 = scmp.ne.s32.totalorder %s50_s28, %s3230_s0  ;;  %p3236_p2 = scmp.lt.s32.totalorder %s3230_s0, %s3230_s0 }
   0xe   :  { %p3237_p3 = por %p3236_p2, %p3235_p1 }
  0x10   :  { %p3238_p4 = pnand %p3237_p3, %p3231_p0 }
  0x12   :  { %3241 = shalt.err (!%p3238_p4)
}
  0x13   :  { %s5011_s20 = sld [smem:[#allocation54_spill]]  ;;  %s3250_s21 = scalar_lea.vmem %s76_s30, 64 }
  0x14   :  { %p3251_p5 = scmp.ne.s32.totalorder %s76_s30, %s3250_s21  ;;  %p3255_p6 = scmp.lt.s32.totalorder %s76_s30, %s76_s30 }
  0x15   :  { %p3256_p7 = scmp.lt.s32.totalorder %s3250_s21, %s3250_s21 }
  0x17   :  { %p3257_p8 = por %p3256_p7, %p3255_p6 }
  0x19   :  { %52 = dma.hbm_to_vmem [thread:$0]  %s5011_s20, 32, %s50_s28, [#allocation6]  }
  0x1a   :  { %p3258_p9 = pnand %p3257_p8, %p3251_p5 }
  0x1c   :  { %3261 = shalt.err (!%p3258_p9)
}
  0x1d   :  { %78 = dma.hbm_to_vmem [thread:$0]  %s4962_s6, 64, %s76_s30, [#allocation9]  }
  0x1e   :  { %s3416_s23 = smov [#allocation11]   ;;  %s3417_s25 = smov [#allocation2]  }
  0x1f   :  { %s96_s24 = sshll.u32 %s3416_s23, 4  ;;  %s36_s26 = sshll.u32 %s3417_s25, 4  ;;  %s97_s24 = int_to_ptr.vmem [resolvable:$true] %s96_s24  ;;  %s37_s26 = int_to_ptr.vmem [resolvable:$true] %s36_s26 }
  0x20   :  { %s3270_s27 = scalar_lea.vmem %s97_s24, 1024  ;;  %p3275_p11 = scmp.lt.s32.totalorder %s97_s24, %s97_s24 }
  0x21   :  { %p3271_p10 = scmp.ne.s32.totalorder %s97_s24, %s3270_s27  ;;  %p3276_p12 = scmp.lt.s32.totalorder %s3270_s27, %s3270_s27 }
  0x23   :  { %p3277_p13 = por %p3276_p12, %p3275_p11 }
  0x25   :  { %p3278_p0 = pnand %p3277_p13, %p3271_p10 }
  0x27   :  { %3281 = shalt.err (!%p3278_p0)
}
  0x28   :  { %s3418_s28 = smov 512   ;;  %s3419_s29 = smov 32  }
  0x29   :  { %102 = dma.hbm_to_vmem [thread:$0]  %s4965_s9, 1024, %s97_s24, [#allocation12], %s3418_s28, %s3418_s28, %s3419_s29  }
  0x2a   :  { %s3290_s6 = scalar_lea.vmem %s37_s26, 512  ;;  %p3295_p2 = scmp.lt.s32.totalorder %s37_s26, %s37_s26 }
  0x2b   :  { %p3291_p1 = scmp.ne.s32.totalorder %s37_s26, %s3290_s6  ;;  %p3296_p3 = scmp.lt.s32.totalorder %s3290_s6, %s3290_s6 }
  0x2d   :  { %p3297_p4 = por %p3296_p3, %p3295_p2 }
  0x2f   :  { %p3298_p5 = pnand %p3297_p4, %p3291_p1 }
  0x31   :  { %3301 = shalt.err (!%p3298_p5)
}
  0x32   :  { %s3420_s30 = smov 256   ;;  %s3421_s1 = smov 16  }
  0x33   :  { %s5012_s22 = sld [smem:[#allocation53_spill]]  ;;  %s3422_s2 = smov [#allocation7]  }
  0x34   :  { %s58_s23 = sshll.u32 %s3422_s2, 4  ;;  %s3423_s25 = smov [#allocation10]   ;;  %s59_s23 = int_to_ptr.vmem [resolvable:$true] %s58_s23 }
  0x35   :  { %s85_s27 = sshll.u32 %s3423_s25, 4  ;;  %s3310_s9 = scalar_lea.vmem %s59_s23, 16384  ;;  %s86_s27 = int_to_ptr.vmem [resolvable:$true] %s85_s27 }
  0x36   :  { %p3311_p6 = scmp.ne.s32.totalorder %s59_s23, %s3310_s9  ;;  %p3315_p7 = scmp.lt.s32.totalorder %s59_s23, %s59_s23 }
  0x37   :  { %p3316_p8 = scmp.lt.s32.totalorder %s3310_s9, %s3310_s9 }
  0x39   :  { %42 = dma.hbm_to_vmem [thread:$0]  %s5012_s22, 512, %s37_s26, [#allocation3], %s3420_s30, %s3420_s30, %s3421_s1  }
  0x3a   :  { %p3317_p9 = por %p3316_p8, %p3315_p7 }
  0x3c   :  { %p3318_p10 = pnand %p3317_p9, %p3311_p6 }
  0x3e   :  { %3321 = shalt.err (!%p3318_p10)
}
  0x3f   :  { %64 = dma.hbm_to_vmem [thread:$0]  %s4959_s3, 16384, %s59_s23, [#allocation6], %s3418_s28, %s3418_s28, %s3419_s29  }
  0x40   :  { %s3330_s19 = scalar_lea.vmem %s86_s27, 64  ;;  %p3335_p12 = scmp.lt.s32.totalorder %s86_s27, %s86_s27 }
  0x41   :  { %p3331_p11 = scmp.ne.s32.totalorder %s86_s27, %s3330_s19  ;;  %p3336_p13 = scmp.lt.s32.totalorder %s3330_s19, %s3330_s19 }
  0x43   :  { %p3337_p0 = por %p3336_p13, %p3335_p12 }
  0x45   :  { %p3338_p1 = pnand %p3337_p0, %p3331_p11 }
  0x47   :  { %3341 = shalt.err (!%p3338_p1)
}
  0x48   :  { %88 = dma.hbm_to_vmem [thread:$0]  %s4963_s7, 64, %s86_s27, [#allocation9]  }
  0x49   :  { %s3424_s30 = smov [#allocation13]   ;;  %s3425_s20 = smov [#allocation14]  }
  0x4a   :  { %s111_s1 = sshll.u32 %s3424_s30, 4  ;;  %s123_s21 = sshll.u32 %s3425_s20, 4  ;;  %s112_s1 = int_to_ptr.vmem [resolvable:$true] %s111_s1  ;;  %s124_s21 = int_to_ptr.vmem [resolvable:$true] %s123_s21 }
  0x4b   :  { %s3350_s22 = scalar_lea.vmem %s112_s1, 16  ;;  %s3354_s3 = scalar_lea.vmem %s112_s1, 32 }
  0x4c   :  { %p3351_p2 = scmp.ne.s32.totalorder %s112_s1, %s3350_s22  ;;  %p3355_p3 = scmp.lt.s32.totalorder %s112_s1, %s112_s1 }
  0x4d   :  { %p3356_p4 = scmp.lt.s32.totalorder %s3354_s3, %s3350_s22 }
  0x4f   :  { %p3357_p5 = por %p3356_p4, %p3355_p3 }
  0x51   :  { %p3358_p6 = pnand %p3357_p5, %p3351_p2 }
  0x53   :  { %3361 = shalt.err (!%p3358_p6)
}
  0x54   :  { %114 = dma.hbm_to_vmem [thread:$0]  %s4967_s11, 16, %s112_s1, [#allocation12]  }
  0x55   :  { %s3370_s2 = scalar_lea.vmem %s124_s21, 16  ;;  %s3374_s7 = scalar_lea.vmem %s124_s21, 32 }
  0x56   :  { %p3371_p7 = scmp.ne.s32.totalorder %s124_s21, %s3370_s2  ;;  %p3375_p8 = scmp.lt.s32.totalorder %s124_s21, %s124_s21 }
  0x57   :  { %p3376_p9 = scmp.lt.s32.totalorder %s3374_s7, %s3370_s2 }
  0x59   :  { %p3377_p10 = por %p3376_p9, %p3375_p8 }
  0x5b   :  { %p3378_p11 = pnand %p3377_p10, %p3371_p7 }
  0x5d   :  { %3381 = shalt.err (!%p3378_p11)
}
  0x5e   :  { %126 = dma.hbm_to_vmem [thread:$0]  %s4969_s13, 16, %s124_s21, [#allocation15]  }
  0x5f   :  { %3402 = dma.done.wait [#allocation3], 512  }
  0x60   :  { %3403 = vsyncadd [#allocation3], 4294966784 }
  0x61   :  { %3404 = dma.done.wait [#allocation6], 16416  }
  0x62   :  { %3405 = vsyncadd [#allocation6], 4294950880 }
  0x63   :  { %3406 = dma.done.wait [#allocation9], 128  }
  0x64   :  { %3407 = vsyncadd [#allocation9], 4294967168 }
  0x65   :  { %3408 = dma.done.wait [#allocation12], 1040  }
  0x66   :  { %3409 = vsyncadd [#allocation12], 4294966256 }
  0x67   :  { %3410 = dma.done.wait [#allocation15], 16  }
  0x68   :  { %3411 = vsyncadd [#allocation15], 4294967280  ;;  %v4976_v0 = vmov 0.0   ;;  %v164_v1 = vld [vmem:[#allocation2 + $0x18] sm:$0xff]  ;;  %v163_v2 = vld [vmem:[#allocation2 + $0x10] sm:$0xff]  ;;  %s5013_s27 = sld [smem:[#allocation52_spill]] }
  0x69   :  { %248 = vmatprep.mubr.f32.mxu0 %v4976_v0  ;;  %873 = vmatprep.mubr.f32.mxu1 %v4976_v0  ;;  %v162_v3 = vld [vmem:[#allocation2 + $0x8] sm:$0xff]  ;;  %v161_v4 = vld [vmem:[#allocation2] sm:$0xff]  ;;  %vm177_vm0 = vcmask 130048   ;;  %v808_v7 = vld [vmem:[%s4960_s4 + $0x38] sm:$0xff]  ;;  %s3433_s25 = smov [#allocation16]  }
  0x6a   :  { %212 = vmatprep.subr.mxu0 %v164_v1  ;;  %v806_v8 = vld [vmem:[%s4960_s4 + $0x28] sm:$0xff]  ;;  %v807_v9 = vld [vmem:[%s4960_s4 + $0x30] sm:$0xff]  ;;  %v805_v10 = vld [vmem:[%s4960_s4 + $0x20] sm:$0xff] }
  0x6b   :  { %213 = vmatpush1.msra.mxu0 %v163_v2  ;;  %837 = vmatprep.subr.mxu1 %v806_v8  ;;  %v804_v11 = vld [vmem:[%s4960_s4 + $0x18] sm:$0xff]  ;;  %v802_v12 = vld [vmem:[%s4960_s4 + $0x8] sm:$0xff]  ;;  %v803_v13 = vld [vmem:[%s4960_s4 + $0x10] sm:$0xff] }
  0x6c   :  { %214 = vmatprep.subr.mxu0 %v162_v3  ;;  %838 = vmatpush1.msra.mxu1 %v805_v10  ;;  %v801_v14 = vld [vmem:[%s4960_s4] sm:$0xff]  ;;  %v734_v15 = vld [vmem:[#allocation7 + $0x1e8] sm:$0xff]  ;;  %v735_v18 = vld [vmem:[#allocation7 + $0x1f0] sm:$0xff] }
  0x6d   :  { %215 = vmatpush1.msra.mxu0 %v161_v4  ;;  %839 = vmatprep.subr.mxu1 %v802_v12  ;;  %v736_v16 = vld [vmem:[#allocation7 + $0x1f8] sm:$0xff]  ;;  %v733_v17 = vld [vmem:[#allocation7 + $0x1e0] sm:$0xff]  ;;  %v730_v19 = vld [vmem:[#allocation7 + $0x1c8] sm:$0xff] }
  0x6e   :  { %v159_v5 = vld [vmem:[%s5013_s27] sm:$0xff]  ;;  %v3565_v6 = vld [vmem:[%s5013_s27 + $0x8] sm:$0xff]  ;;  %914 = vmatprep.subr.mxu0 %v808_v7  ;;  %840 = vmatpush1.msra.mxu1 %v801_v14  ;;  %v731_v22 = vld [vmem:[#allocation7 + $0x1d0] sm:$0xff] }
  0x6f   :  { %2683 = vmatmul.mubr.msk.f32.vlgmr.msra.gmra.mxu0 %vm177_vm0, %v159_v5  ;;  %2701 = vmatmul.mubr.msk.f32.vlgmr.msra.gmra.mxu1 %vm177_vm0, %v159_v5  ;;  %v732_v20 = vld [vmem:[#allocation7 + $0x1d8] sm:$0xff]  ;;  %v729_v21 = vld [vmem:[#allocation7 + $0x1c0] sm:$0xff]  ;;  %v726_v23 = vld [vmem:[#allocation7 + $0x1a8] sm:$0xff] }
  0x70   :  { %254 = vmatprep.mubr.f32.mxu0 %v4976_v0  ;;  %915 = vmatpush1.msra.mxu0 %v807_v9  ;;  %v728_v24 = vld [vmem:[#allocation7 + $0x1b8] sm:$0xff]  ;;  %v725_v25 = vld [vmem:[#allocation7 + $0x1a0] sm:$0xff]  ;;  %v727_v26 = vld [vmem:[#allocation7 + $0x1b0] sm:$0xff] }
  0x71   :  { %916 = vmatprep.subr.mxu0 %v804_v11  ;;  %963 = vmatprep.subr.mxu1 %v734_v15  ;;  %v722_v27 = vld [vmem:[#allocation7 + $0x188] sm:$0xff]  ;;  %v724_v28 = vld [vmem:[#allocation7 + $0x198] sm:$0xff]  ;;  %v721_v29 = vld [vmem:[#allocation7 + $0x180] sm:$0xff] }
  0x72   :  { %917 = vmatpush1.msra.mxu0 %v803_v13  ;;  %964 = vmatpush1.msra.mxu1 %v733_v17  ;;  %v723_v30 = vld [vmem:[#allocation7 + $0x190] sm:$0xff]  ;;  %v718_v31 = vld [vmem:[#allocation7 + $0x168] sm:$0xff]  ;;  %v720_v32 = vld [vmem:[#allocation7 + $0x178] sm:$0xff] }
  0x73   :  { %2684 = vmatmul.mubr.msk.f32.gmra.mxu0 %vm177_vm0, %v3565_v6  ;;  %1040 = vmatprep.subr.mxu0 %v736_v16  ;;  %v717_v33 = vld [vmem:[#allocation7 + $0x160] sm:$0xff]  ;;  %v719_v34 = vld [vmem:[#allocation7 + $0x170] sm:$0xff]  ;;  %v714_v35 = vld [vmem:[#allocation7 + $0x148] sm:$0xff] }
  0x74   :  { %950 = vmatprep.mubr.f32.mxu0 %v4976_v0  ;;  %965 = vmatprep.subr.mxu1 %v730_v19  ;;  %v716_v36 = vld [vmem:[#allocation7 + $0x158] sm:$0xff]  ;;  %v713_v37 = vld [vmem:[#allocation7 + $0x140] sm:$0xff]  ;;  %v715_v38 = vld [vmem:[#allocation7 + $0x150] sm:$0xff] }
  0x75   :  { %966 = vmatpush1.msra.mxu1 %v729_v21  ;;  %v710_v39 = vld [vmem:[#allocation7 + $0x128] sm:$0xff]  ;;  %v712_v40 = vld [vmem:[#allocation7 + $0x138] sm:$0xff]  ;;  %v709_v41 = vld [vmem:[#allocation7 + $0x120] sm:$0xff]  ;;  %879 = vmatprep.mubr.f32.mxu1 %v4976_v0 }
  0x76   :  { %967 = vmatprep.subr.mxu1 %v726_v23  ;;  %v711_v42 = vld [vmem:[#allocation7 + $0x130] sm:$0xff]  ;;  %v706_v43 = vld [vmem:[#allocation7 + $0x108] sm:$0xff]  ;;  %v708_v44 = vld [vmem:[#allocation7 + $0x118] sm:$0xff]  ;;  %2702 = vmatmul.mubr.msk.f32.gmra.mxu1 %vm177_vm0, %v3565_v6 }
  0x77   :  { %2703 = vmatmul.mubr.msk.f32.vlgmr.msra.gmra.mxu0 %vm177_vm0, %v159_v5  ;;  %968 = vmatpush1.msra.mxu1 %v725_v25  ;;  %v705_v45 = vld [vmem:[#allocation7 + $0x100] sm:$0xff]  ;;  %v707_v46 = vld [vmem:[#allocation7 + $0x110] sm:$0xff]  ;;  %v702_v47 = vld [vmem:[#allocation7 + $0xe8] sm:$0xff] }
  0x78   :  { %1041 = vmatpush1.msra.mxu0 %v735_v18  ;;  %969 = vmatprep.subr.mxu1 %v722_v27  ;;  %v704_v48 = vld [vmem:[#allocation7 + $0xf8] sm:$0xff]  ;;  %v701_v49 = vld [vmem:[#allocation7 + $0xe0] sm:$0xff]  ;;  %v703_v50 = vld [vmem:[#allocation7 + $0xf0] sm:$0xff] }
  0x79   :  { %1042 = vmatprep.subr.mxu0 %v732_v20  ;;  %970 = vmatpush1.msra.mxu1 %v721_v29  ;;  %v698_v51 = vld [vmem:[#allocation7 + $0xc8] sm:$0xff]  ;;  %v700_v52 = vld [vmem:[#allocation7 + $0xd8] sm:$0xff]  ;;  %v697_v53 = vld [vmem:[#allocation7 + $0xc0] sm:$0xff] }
  0x7a   :  { %1043 = vmatpush1.msra.mxu0 %v731_v22  ;;  %971 = vmatprep.subr.mxu1 %v718_v31  ;;  %v699_v54 = vld [vmem:[#allocation7 + $0xd0] sm:$0xff]  ;;  %v694_v55 = vld [vmem:[#allocation7 + $0xa8] sm:$0xff]  ;;  %v696_v56 = vld [vmem:[#allocation7 + $0xb8] sm:$0xff] }
  0x7b   :  { %1044 = vmatprep.subr.mxu0 %v728_v24  ;;  %972 = vmatpush1.msra.mxu1 %v717_v33  ;;  %v693_v57 = vld [vmem:[#allocation7 + $0xa0] sm:$0xff]  ;;  %v695_v58 = vld [vmem:[#allocation7 + $0xb0] sm:$0xff]  ;;  %v690_v59 = vld [vmem:[#allocation7 + $0x88] sm:$0xff] }
  0x7c   :  { %1045 = vmatpush1.msra.mxu0 %v727_v26  ;;  %973 = vmatprep.subr.mxu1 %v714_v35  ;;  %v692_v60 = vld [vmem:[#allocation7 + $0x98] sm:$0xff]  ;;  %v689_v61 = vld [vmem:[#allocation7 + $0x80] sm:$0xff]  ;;  %v691_v62 = vld [vmem:[#allocation7 + $0x90] sm:$0xff] }
  0x7d   :  { %1046 = vmatprep.subr.mxu0 %v724_v28  ;;  %974 = vmatpush1.msra.mxu1 %v713_v37  ;;  %v686_v63 = vld [vmem:[#allocation7 + $0x68] sm:$0xff]  ;;  %v688_v1 = vld [vmem:[#allocation7 + $0x78] sm:$0xff]  ;;  %v685_v2 = vld [vmem:[#allocation7 + $0x60] sm:$0xff] }
  0x7e   :  { %1047 = vmatpush1.msra.mxu0 %v723_v30  ;;  %975 = vmatprep.subr.mxu1 %v710_v39  ;;  %v687_v3 = vld [vmem:[#allocation7 + $0x70] sm:$0xff]  ;;  %v682_v4 = vld [vmem:[#allocation7 + $0x48] sm:$0xff]  ;;  %v684_v5 = vld [vmem:[#allocation7 + $0x58] sm:$0xff] }
  0x7f   :  { %1048 = vmatprep.subr.mxu0 %v720_v32  ;;  %976 = vmatpush1.msra.mxu1 %v709_v41  ;;  %v681_v7 = vld [vmem:[#allocation7 + $0x40] sm:$0xff]  ;;  %v683_v8 = vld [vmem:[#allocation7 + $0x50] sm:$0xff]  ;;  %v678_v9 = vld [vmem:[#allocation7 + $0x28] sm:$0xff] }
  0x80   :  { %1049 = vmatpush1.msra.mxu0 %v719_v34  ;;  %977 = vmatprep.subr.mxu1 %v706_v43  ;;  %v680_v10 = vld [vmem:[#allocation7 + $0x38] sm:$0xff]  ;;  %v677_v11 = vld [vmem:[#allocation7 + $0x20] sm:$0xff]  ;;  %v679_v12 = vld [vmem:[#allocation7 + $0x30] sm:$0xff] }
  0x81   :  { %1050 = vmatprep.subr.mxu0 %v716_v36  ;;  %978 = vmatpush1.msra.mxu1 %v705_v45  ;;  %v674_v13 = vld [vmem:[#allocation7 + $0x8] sm:$0xff]  ;;  %v676_v14 = vld [vmem:[#allocation7 + $0x18] sm:$0xff]  ;;  %v673_v15 = vld [vmem:[#allocation7] sm:$0xff] }
  0x82   :  { %1051 = vmatpush1.msra.mxu0 %v715_v38  ;;  %979 = vmatprep.subr.mxu1 %v702_v47  ;;  %v675_v16 = vld [vmem:[#allocation7 + $0x10] sm:$0xff]  ;;  %v798_v17 = vld [vmem:[#allocation7 + $0x3e8] sm:$0xff]  ;;  %v800_v18 = vld [vmem:[#allocation7 + $0x3f8] sm:$0xff] }
  0x83   :  { %1052 = vmatprep.subr.mxu0 %v712_v40  ;;  %980 = vmatpush1.msra.mxu1 %v701_v49  ;;  %v797_v19 = vld [vmem:[#allocation7 + $0x3e0] sm:$0xff]  ;;  %v799_v20 = vld [vmem:[#allocation7 + $0x3f0] sm:$0xff]  ;;  %v794_v21 = vld [vmem:[#allocation7 + $0x3c8] sm:$0xff] }
  0x84   :  { %1053 = vmatpush1.msra.mxu0 %v711_v42  ;;  %981 = vmatprep.subr.mxu1 %v698_v51  ;;  %v796_v22 = vld [vmem:[#allocation7 + $0x3d8] sm:$0xff]  ;;  %v793_v23 = vld [vmem:[#allocation7 + $0x3c0] sm:$0xff]  ;;  %v795_v24 = vld [vmem:[#allocation7 + $0x3d0] sm:$0xff] }
  0x85   :  { %1054 = vmatprep.subr.mxu0 %v708_v44  ;;  %982 = vmatpush1.msra.mxu1 %v697_v53  ;;  %v790_v25 = vld [vmem:[#allocation7 + $0x3a8] sm:$0xff]  ;;  %v792_v26 = vld [vmem:[#allocation7 + $0x3b8] sm:$0xff]  ;;  %v789_v27 = vld [vmem:[#allocation7 + $0x3a0] sm:$0xff] }
  0x86   :  { %1055 = vmatpush1.msra.mxu0 %v707_v46  ;;  %983 = vmatprep.subr.mxu1 %v694_v55  ;;  %v791_v28 = vld [vmem:[#allocation7 + $0x3b0] sm:$0xff]  ;;  %v786_v29 = vld [vmem:[#allocation7 + $0x388] sm:$0xff]  ;;  %v788_v30 = vld [vmem:[#allocation7 + $0x398] sm:$0xff] }
  0x87   :  { %1056 = vmatprep.subr.mxu0 %v704_v48  ;;  %984 = vmatpush1.msra.mxu1 %v693_v57  ;;  %v785_v31 = vld [vmem:[#allocation7 + $0x380] sm:$0xff]  ;;  %v787_v32 = vld [vmem:[#allocation7 + $0x390] sm:$0xff]  ;;  %v782_v33 = vld [vmem:[#allocation7 + $0x368] sm:$0xff] }
  0x88   :  { %1057 = vmatpush1.msra.mxu0 %v703_v50  ;;  %985 = vmatprep.subr.mxu1 %v690_v59  ;;  %v784_v34 = vld [vmem:[#allocation7 + $0x378] sm:$0xff]  ;;  %v781_v35 = vld [vmem:[#allocation7 + $0x360] sm:$0xff]  ;;  %v783_v36 = vld [vmem:[#allocation7 + $0x370] sm:$0xff] }
  0x89   :  { %1058 = vmatprep.subr.mxu0 %v700_v52  ;;  %986 = vmatpush1.msra.mxu1 %v689_v61  ;;  %v778_v37 = vld [vmem:[#allocation7 + $0x348] sm:$0xff]  ;;  %v780_v38 = vld [vmem:[#allocation7 + $0x358] sm:$0xff]  ;;  %v777_v39 = vld [vmem:[#allocation7 + $0x340] sm:$0xff] }
  0x8a   :  { %1059 = vmatpush1.msra.mxu0 %v699_v54  ;;  %987 = vmatprep.subr.mxu1 %v686_v63  ;;  %v779_v40 = vld [vmem:[#allocation7 + $0x350] sm:$0xff]  ;;  %v774_v41 = vld [vmem:[#allocation7 + $0x328] sm:$0xff]  ;;  %v776_v42 = vld [vmem:[#allocation7 + $0x338] sm:$0xff] }
  0x8b   :  { %1060 = vmatprep.subr.mxu0 %v696_v56  ;;  %988 = vmatpush1.msra.mxu1 %v685_v2  ;;  %v773_v43 = vld [vmem:[#allocation7 + $0x320] sm:$0xff]  ;;  %v775_v44 = vld [vmem:[#allocation7 + $0x330] sm:$0xff]  ;;  %v770_v45 = vld [vmem:[#allocation7 + $0x308] sm:$0xff] }
  0x8c   :  { %1061 = vmatpush1.msra.mxu0 %v695_v58  ;;  %989 = vmatprep.subr.mxu1 %v682_v4  ;;  %v772_v46 = vld [vmem:[#allocation7 + $0x318] sm:$0xff]  ;;  %v769_v47 = vld [vmem:[#allocation7 + $0x300] sm:$0xff]  ;;  %v771_v48 = vld [vmem:[#allocation7 + $0x310] sm:$0xff] }
  0x8d   :  { %1062 = vmatprep.subr.mxu0 %v692_v60  ;;  %990 = vmatpush1.msra.mxu1 %v681_v7  ;;  %v766_v49 = vld [vmem:[#allocation7 + $0x2e8] sm:$0xff]  ;;  %v768_v50 = vld [vmem:[#allocation7 + $0x2f8] sm:$0xff]  ;;  %v765_v51 = vld [vmem:[#allocation7 + $0x2e0] sm:$0xff] }
  0x8e   :  { %1063 = vmatpush1.msra.mxu0 %v691_v62  ;;  %991 = vmatprep.subr.mxu1 %v678_v9  ;;  %v767_v52 = vld [vmem:[#allocation7 + $0x2f0] sm:$0xff]  ;;  %v762_v53 = vld [vmem:[#allocation7 + $0x2c8] sm:$0xff]  ;;  %v764_v54 = vld [vmem:[#allocation7 + $0x2d8] sm:$0xff] }
  0x8f   :  { %1064 = vmatprep.subr.mxu0 %v688_v1  ;;  %992 = vmatpush1.msra.mxu1 %v677_v11  ;;  %v761_v55 = vld [vmem:[#allocation7 + $0x2c0] sm:$0xff]  ;;  %v763_v56 = vld [vmem:[#allocation7 + $0x2d0] sm:$0xff]  ;;  %v758_v57 = vld [vmem:[#allocation7 + $0x2a8] sm:$0xff] }
  0x90   :  { %1065 = vmatpush1.msra.mxu0 %v687_v3  ;;  %993 = vmatprep.subr.mxu1 %v674_v13  ;;  %v760_v58 = vld [vmem:[#allocation7 + $0x2b8] sm:$0xff]  ;;  %v757_v59 = vld [vmem:[#allocation7 + $0x2a0] sm:$0xff]  ;;  %v759_v60 = vld [vmem:[#allocation7 + $0x2b0] sm:$0xff] }
  0x91   :  { %1066 = vmatprep.subr.mxu0 %v684_v5  ;;  %994 = vmatpush1.msra.mxu1 %v673_v15  ;;  %v754_v61 = vld [vmem:[#allocation7 + $0x288] sm:$0xff]  ;;  %v756_v62 = vld [vmem:[#allocation7 + $0x298] sm:$0xff]  ;;  %v753_v63 = vld [vmem:[#allocation7 + $0x280] sm:$0xff] }
  0x92   :  { %1067 = vmatpush1.msra.mxu0 %v683_v8  ;;  %995 = vmatprep.subr.mxu1 %v798_v17  ;;  %v755_v1 = vld [vmem:[#allocation7 + $0x290] sm:$0xff]  ;;  %v750_v2 = vld [vmem:[#allocation7 + $0x268] sm:$0xff]  ;;  %v752_v3 = vld [vmem:[#allocation7 + $0x278] sm:$0xff] }
  0x93   :  { %1068 = vmatprep.subr.mxu0 %v680_v10  ;;  %996 = vmatpush2.msra.mxu1 %v797_v19  ;;  %v749_v4 = vld [vmem:[#allocation7 + $0x260] sm:$0xff]  ;;  %v751_v5 = vld [vmem:[#allocation7 + $0x270] sm:$0xff]  ;;  %v746_v7 = vld [vmem:[#allocation7 + $0x248] sm:$0xff] }
  0x94   :  { %1069 = vmatpush1.msra.mxu0 %v679_v12  ;;  %997 = vmatprep.subr.mxu1 %v794_v21  ;;  %v748_v8 = vld [vmem:[#allocation7 + $0x258] sm:$0xff]  ;;  %v745_v9 = vld [vmem:[#allocation7 + $0x240] sm:$0xff]  ;;  %v747_v10 = vld [vmem:[#allocation7 + $0x250] sm:$0xff] }
  0x95   :  { %1070 = vmatprep.subr.mxu0 %v676_v14  ;;  %998 = vmatpush2.msra.mxu1 %v793_v23  ;;  %v742_v11 = vld [vmem:[#allocation7 + $0x228] sm:$0xff]  ;;  %v744_v12 = vld [vmem:[#allocation7 + $0x238] sm:$0xff]  ;;  %v741_v13 = vld [vmem:[#allocation7 + $0x220] sm:$0xff] }
  0x96   :  { %1071 = vmatpush1.msra.mxu0 %v675_v16  ;;  %999 = vmatprep.subr.mxu1 %v790_v25  ;;  %v743_v14 = vld [vmem:[#allocation7 + $0x230] sm:$0xff]  ;;  %v738_v15 = vld [vmem:[#allocation7 + $0x208] sm:$0xff]  ;;  %v740_v16 = vld [vmem:[#allocation7 + $0x218] sm:$0xff] }
  0x97   :  { %1072 = vmatprep.subr.mxu0 %v800_v18  ;;  %1000 = vmatpush2.msra.mxu1 %v789_v27  ;;  %v737_v17 = vld [vmem:[#allocation7 + $0x200] sm:$0xff]  ;;  %v739_v18 = vld [vmem:[#allocation7 + $0x210] sm:$0xff]  ;;  %v165_v21 = vld [vmem:[#allocation5] sm:$0x3] }
  0x98   :  { %1073 = vmatpush2.msra.mxu0 %v799_v20  ;;  %1001 = vmatprep.subr.mxu1 %v786_v29 }
  0x99   :  { %1074 = vmatprep.subr.mxu0 %v796_v22  ;;  %1002 = vmatpush2.msra.mxu1 %v785_v31 }
  0x9a   :  { %1075 = vmatpush2.msra.mxu0 %v795_v24  ;;  %1003 = vmatprep.subr.mxu1 %v782_v33 }
  0x9b   :  { %1076 = vmatprep.subr.mxu0 %v792_v26  ;;  %1004 = vmatpush2.msra.mxu1 %v781_v35 }
  0x9c   :  { %1077 = vmatpush2.msra.mxu0 %v791_v28  ;;  %1005 = vmatprep.subr.mxu1 %v778_v37 }
  0x9d   :  { %1078 = vmatprep.subr.mxu0 %v788_v30  ;;  %1006 = vmatpush2.msra.mxu1 %v777_v39 }
  0x9e   :  { %1079 = vmatpush2.msra.mxu0 %v787_v32  ;;  %1007 = vmatprep.subr.mxu1 %v774_v41 }
  0x9f   :  { %1080 = vmatprep.subr.mxu0 %v784_v34  ;;  %1008 = vmatpush2.msra.mxu1 %v773_v43 }
  0xa0   :  { %1081 = vmatpush2.msra.mxu0 %v783_v36  ;;  %1009 = vmatprep.subr.mxu1 %v770_v45 }
  0xa1   :  { %1082 = vmatprep.subr.mxu0 %v780_v38  ;;  %1010 = vmatpush2.msra.mxu1 %v769_v47 }
  0xa2   :  { %1083 = vmatpush2.msra.mxu0 %v779_v40  ;;  %1011 = vmatprep.subr.mxu1 %v766_v49 }
  0xa3   :  { %1084 = vmatprep.subr.mxu0 %v776_v42  ;;  %1012 = vmatpush2.msra.mxu1 %v765_v51 }
  0xa4   :  { %1085 = vmatpush2.msra.mxu0 %v775_v44  ;;  %1013 = vmatprep.subr.mxu1 %v762_v53 }
  0xa5   :  { %1086 = vmatprep.subr.mxu0 %v772_v46  ;;  %1014 = vmatpush2.msra.mxu1 %v761_v55 }
  0xa6   :  { %1087 = vmatpush2.msra.mxu0 %v771_v48  ;;  %1015 = vmatprep.subr.mxu1 %v758_v57 }
  0xa7   :  { %1088 = vmatprep.subr.mxu0 %v768_v50  ;;  %1016 = vmatpush2.msra.mxu1 %v757_v59  ;;  %v1178_v50 = vld [vmem:[%s4964_s8 + $0xf8] sm:$0xff] }
  0xa8   :  { %1089 = vmatpush2.msra.mxu0 %v767_v52  ;;  %1017 = vmatprep.subr.mxu1 %v754_v61  ;;  %v1210_v52 = vld [vmem:[%s4964_s8 + $0x1f8] sm:$0xff] }
  0xa9   :  { %1090 = vmatprep.subr.mxu0 %v764_v54  ;;  %1018 = vmatpush2.msra.mxu1 %v753_v63 }
  0xaa   :  { %1091 = vmatpush2.msra.mxu0 %v763_v56  ;;  %1019 = vmatprep.subr.mxu1 %v750_v2  ;;  %v3429_v2 = vmov 2131351028  }
  0xab   :  { %1092 = vmatprep.subr.mxu0 %v760_v58  ;;  %956 = vmatprep.mubr.f32.mxu0 %v4976_v0  ;;  %v3427_v58 = vmov 683565275   ;;  %v4326_v0 = vld [vmem:[%s4964_s8] sm:$0xff] }
  0xac   :  { %1093 = vmatpush2.msra.mxu0 %v759_v60  ;;  %1020 = vmatpush2.msra.mxu1 %v749_v4  ;;  %v3428_v60 = vmov 2475754826  }
  0xad   :  { %1094 = vmatprep.subr.mxu0 %v756_v62  ;;  %2704 = vmatmul.mubr.msk.f32.gmra.mxu0 %vm177_vm0, %v3565_v6  ;;  %v167_v6 = vlaneseq }
  0xae   :  { %1095 = vmatpush2.msra.mxu0 %v755_v1  ;;  %1021 = vmatprep.subr.mxu1 %v746_v7 }
  0xaf   :  { %1096 = vmatprep.subr.mxu0 %v752_v3  ;;  %1022 = vmatpush2.msra.mxu1 %v745_v9  ;;  %v3602_v19 = vshrl.u32 %v167_v6, 7  ;;  %v3431_v9 = vmov 920167782  }
  0xb0   :  { %1097 = vmatpush2.msra.mxu0 %v751_v5  ;;  %1023 = vmatprep.subr.mxu1 %v742_v11  ;;  %v3430_v5 = vmov 2102212464  }
  0xb1   :  { %1098 = vmatprep.subr.mxu0 %v748_v8  ;;  %1024 = vmatpush2.msra.mxu1 %v741_v13  ;;  %v3605_v20 = vsub.s32 0, %v3602_v19  ;;  %v3608_v22 = vsub.s32 1, %v3602_v19 }
  0xb2   :  { %1099 = vmatpush2.msra.mxu0 %v747_v10  ;;  %1025 = vmatprep.subr.mxu1 %v738_v15 }
  0xb3   :  { %1100 = vmatprep.subr.mxu0 %v744_v12  ;;  %1026 = vmatpush2.msra.mxu1 %v737_v17  ;;  %5014 = vst [vmem:[#allocation23_spill] sm:$0xff] %v3608_v22  ;;  %v170_v23 = vrot.slane %v165_v21, %v3605_v20  ;;  %v174_v24 = vrot.slane %v165_v21, %v3608_v22  ;;  %v3432_v12 = vmov 1326507024  }
  0xb4   :  { %1101 = vmatpush2.msra.mxu0 %v743_v14  ;;  %2723 = vmatprep.subr.mxu1 %v1178_v50 }
  0xb5   :  { %1102 = vmatprep.subr.mxu0 %v740_v16 }
  0xb6   :  { %1103 = vmatpush2.msra.mxu0 %v739_v18 }
  0xb7   :  { %2761 = vmatprep.subr.mxu0 %v1210_v52 }
 0x12f   :  { %v250_v25 = vpop.f32.mrf.mxu0 }
 0x130   :  { %v3612_v26 = vadd.f32 %v250_v25, %v170_v23 }
 0x131   :  { %v252_v27 = vpop.f32.mrf.mxu0 }
 0x132   :  { %v261_v28 = vand.u32 2147483647, %v3612_v26  ;;  %v264_v29 = vand.u32 2139095040, %v3612_v26  ;;  %v3616_v30 = vadd.f32 %v252_v27, %v174_v24 }
 0x133   :  { %v256_v31 = vpop.f32.mrf.mxu0 }
 0x134   :  { %v265_v32 = vshrl.u32 %v264_v29, 23  ;;  %v367_v33 = vand.u32 2139095040, %v3616_v30  ;;  %v3619_v34 = vadd.f32 %v256_v31, %v170_v23  ;;  %v268_v37 = vand.u32 8388607, %v261_v28 }
 0x135   :  { %v258_v35 = vpop.f32.mrf.mxu0  ;;  %v364_v44 = vand.u32 2147483647, %v3616_v30 }
 0x136   :  { %v2685_v36 = vadd.s32 4294967169, %v265_v32  ;;  %v368_v38 = vshrl.u32 %v367_v33, 23  ;;  %v3623_v39 = vadd.f32 %v258_v35, %v174_v24  ;;  %v470_v40 = vand.u32 2139095040, %v3619_v34 }
 0x137   :  { %v269_v45 = vor.u32 8388608, %v268_v37  ;;  %v3636_v53 = vand.u32 8388607, %v364_v44 }
 0x138   :  { %v271_v41 = vadd.s32 1, %v2685_v36  ;;  %v2689_v42 = vadd.s32 4294967169, %v368_v38  ;;  %v573_v43 = vand.u32 2139095040, %v3623_v39  ;;  %v471_v47 = vshrl.u32 %v470_v40, 23 }
 0x139   :  { %v3638_v56 = vshll.u32 %v269_v45, 8 }
 0x13a   :  { %vm272_vm1 = vcmp.gt.s32.totalorder %v271_v41, 0  ;;  %v374_v46 = vadd.s32 1, %v2689_v42  ;;  %v574_v49 = vshrl.u32 %v573_v43, 23  ;;  %v2693_v57 = vadd.s32 4294967169, %v471_v47 }
 0x13b   :  { %v273_v48 = vsel %vm272_vm1, %v271_v41, 0 }
 0x13c   :  { %v275_v51 = vand.u32 31, %v273_v48  ;;  %vm375_vm2 = vcmp.gt.s32.totalorder %v374_v46, 0  ;;  %v274_v54 = vshrl.u32 %v273_v48, 5  ;;  %v2697_v63 = vadd.s32 4294967169, %v574_v49 }
 0x13d   :  { %v376_v62 = vsel %vm375_vm2, %v374_v46, 0  ;;  %v477_v31 = vadd.s32 1, %v2693_v57  ;;  %v372_v48 = vor.u32 8388608, %v3636_v53 }
 0x13e   :  { %v276_v55 = vsub.s32 32, %v275_v51  ;;  %v278_v59 = vshll.u32 %v3427_v58, %v275_v51  ;;  %v281_v61 = vshll.u32 %v3428_v60, %v275_v51  ;;  %v284_v4 = vshll.u32 %v3429_v2, %v275_v51 }
 0x13f   :  { %v287_v8 = vshll.u32 %v3430_v5, %v275_v51  ;;  %v290_v11 = vshll.u32 %v3431_v9, %v275_v51  ;;  %vm293_vm3 = vcmp.lt.s32.totalorder %v274_v54, 1  ;;  %vm296_vm4 = vcmp.lt.s32.totalorder %v274_v54, 4 }
 0x140   :  { %v279_v1 = vshrl.u32 %v3428_v60, %v276_v55  ;;  %v282_v3 = vshrl.u32 %v3429_v2, %v276_v55  ;;  %v285_v7 = vshrl.u32 %v3430_v5, %v276_v55  ;;  %v288_v10 = vshrl.u32 %v3431_v9, %v276_v55 }
 0x141   :  { %v291_v13 = vshrl.u32 %v3432_v12, %v276_v55  ;;  %v378_v6 = vand.u32 31, %v376_v62  ;;  %v277_v21 = vshrl.u32 %v3427_v58, %v276_v55  ;;  %vm295_vm5 = vcmp.lt.s32.totalorder %v274_v54, 3 }
 0x142   :  { %v280_v14 = vor.u32 %v279_v1, %v278_v59  ;;  %v283_v15 = vor.u32 %v282_v3, %v281_v61  ;;  %v286_v16 = vor.u32 %v285_v7, %v284_v4  ;;  %v289_v17 = vor.u32 %v288_v10, %v287_v8 }
 0x143   :  { %v292_v18 = vor.u32 %v291_v13, %v290_v11  ;;  %vm294_vm6 = vcmp.lt.s32.totalorder %v274_v54, 2  ;;  %v379_v40 = vsub.s32 32, %v378_v6  ;;  %v580_v47 = vadd.s32 1, %v2697_v63 }
 0x144   :  { %v298_v23 = vsel %vm296_vm4, %v286_v16, 2102212464  ;;  %v301_v24 = vsel %vm293_vm3, %v280_v14, %v283_v15  ;;  %v305_v25 = vsel %vm293_vm3, %v283_v15, %v286_v16  ;;  %v302_v27 = vsel %vm296_vm4, %v289_v17, 920167782 }
 0x145   :  { %v306_v29 = vsel %vm296_vm4, %v292_v18, 1326507024  ;;  %v297_v32 = vsel %vm293_vm3, %v277_v21, %v280_v14  ;;  %v303_v33 = vsel %vm295_vm5, %v286_v16, %v302_v27  ;;  %v299_v36 = vsel %vm295_vm5, %v283_v15, %v298_v23 }
 0x146   :  { %v307_v35 = vsel %vm295_vm5, %v289_v17, %v306_v29  ;;  %v304_v37 = vsel %vm294_vm6, %v301_v24, %v303_v33  ;;  %v300_v46 = vsel %vm294_vm6, %v297_v32, %v299_v36  ;;  %vm478_vm7 = vcmp.gt.s32.totalorder %v477_v31, 0 }
 0x147   :  { %v308_v38 = vsel %vm294_vm6, %v305_v25, %v307_v35  ;;  %v3656_v43 = vmul.u32.u64.low %v3638_v56, %v304_v37  ;;  %v3657_v45 = vmul.u32.u64.high %v3638_v56, %v304_v37, %v3656_v43  ;;  %v394_v50 = vshrl.u32 %v3432_v12, %v379_v40 }
 0x148   :  { %v3652_v41 = vmul.u32.u64.low %v3638_v56, %v308_v38  ;;  %v3653_v42 = vmul.u32.u64.high %v3638_v56, %v308_v38, %v3652_v41  ;;  %vm581_vm9 = vcmp.gt.s32.totalorder %v580_v47, 0  ;;  %v316_v51 = vmul.u32 %v3638_v56, %v300_v46 }
 0x149   :  { %v319_v49 = vadd.s32 1, %v3657_v45  ;;  %v377_v52 = vshrl.u32 %v376_v62, 5  ;;  %v391_v54 = vshrl.u32 %v3431_v9, %v379_v40  ;;  %v570_v55 = vand.u32 2147483647, %v3623_v39 }
 0x14a   :  { %vm318_vm8 = vc.u32 %v3653_v42, %v3656_v43  ;;  %v393_v59 = vshll.u32 %v3431_v9, %v378_v6  ;;  %v582_v53 = vsel %vm581_vm9, %v580_v47, 0  ;;  %v382_v61 = vshrl.u32 %v3428_v60, %v379_v40 }
 0x14b   :  { %v320_v57 = vsel %vm318_vm8, %v319_v49, %v3657_v45  ;;  %v390_v1 = vshll.u32 %v3430_v5, %v378_v6  ;;  %v479_v3 = vsel %vm478_vm7, %v477_v31, 0  ;;  %v381_v4 = vshll.u32 %v3427_v58, %v378_v6 }
 0x14c   :  { %v321_v63 = vadd.s32 %v320_v57, %v316_v51  ;;  %v395_v56 = vor.u32 %v394_v50, %v393_v59  ;;  %v3674_v62 = vand.u32 31, %v582_v53  ;;  %v384_v7 = vshll.u32 %v3428_v60, %v378_v6 }
 0x14d   :  { %v385_v8 = vshrl.u32 %v3429_v2, %v379_v40  ;;  %v392_v11 = vor.u32 %v391_v54, %v390_v1  ;;  %v383_v13 = vor.u32 %v382_v61, %v381_v4  ;;  %v412_v15 = vshll.u32 %v372_v48, 8 }
 0x14e   :  { %v322_v10 = vadd.s32 536870912, %v321_v63  ;;  %vm399_vm10 = vcmp.lt.s32.totalorder %v377_v52, 4  ;;  %v3680_v17 = vand.u32 31, %v479_v3  ;;  %v3683_v18 = vsub.s32 32, %v3674_v62 }
 0x14f   :  { %v386_v14 = vor.u32 %v385_v8, %v384_v7  ;;  %v409_v21 = vsel %vm399_vm10, %v395_v56, 1326507024  ;;  %v387_v23 = vshll.u32 %v3429_v2, %v378_v6  ;;  %v388_v24 = vshrl.u32 %v3430_v5, %v379_v40 }
 0x150   :  { %v3678_v16 = vshrl.u32 %v322_v10, 30  ;;  %v3690_v25 = vand.u32 8388607, %v570_v55  ;;  %v405_v29 = vsel %vm399_vm10, %v392_v11, 920167782  ;;  %v380_v31 = vshrl.u32 %v3427_v58, %v379_v40 }
 0x151   :  { %vm396_vm11 = vcmp.lt.s32.totalorder %v377_v52, 1  ;;  %v3695_v32 = vshrl.u32 %v479_v3, 5  ;;  %v389_v33 = vor.u32 %v388_v24, %v387_v23  ;;  %vm398_vm12 = vcmp.lt.s32.totalorder %v377_v52, 3 }
 0x152   :  { %v324_v27 = vshll.u32 %v3678_v16, 30  ;;  %v404_v35 = vsel %vm396_vm11, %v383_v13, %v386_v14  ;;  %v3701_v36 = vsub.s32 32, %v3680_v17  ;;  %v600_v37 = vshrl.u32 %v3432_v12, %v3683_v18 }
 0x153   :  { %v410_v38 = vsel %vm398_vm12, %v392_v11, %v409_v21  ;;  %vm397_vm13 = vcmp.lt.s32.totalorder %v377_v52, 2  ;;  %v400_v41 = vsel %vm396_vm11, %v380_v31, %v383_v13  ;;  %v401_v40 = vsel %vm399_vm10, %v389_v33, 2102212464 }
 0x154   :  { %v3698_v6 = vsub.s32 %v321_v63, %v324_v27  ;;  %v406_v45 = vsel %vm398_vm12, %v389_v33, %v405_v29  ;;  %v402_v47 = vsel %vm398_vm12, %v386_v14, %v401_v40  ;;  %v408_v49 = vsel %vm396_vm11, %v386_v14, %v389_v33 }
 0x155   :  { %v407_v48 = vsel %vm397_vm13, %v404_v35, %v406_v45  ;;  %v599_v50 = vshll.u32 %v3431_v9, %v3674_v62  ;;  %v411_v51 = vsel %vm397_vm13, %v408_v49, %v410_v38  ;;  %v597_v61 = vshrl.u32 %v3431_v9, %v3683_v18 }
 0x156   :  { %v327_v46 = vsub.s32 0, %v3698_v6  ;;  %v3713_v54 = vmul.u32.u64.low %v412_v15, %v407_v48  ;;  %v3714_v57 = vmul.u32.u64.high %v412_v15, %v407_v48, %v3713_v54  ;;  %v317_v3 = vadd.s32 %v3656_v43, %v3653_v42 }
 0x157   :  { %v3720_v63 = vmul.u32.u64.low %v412_v15, %v411_v51  ;;  %v3721_v1 = vmul.u32.u64.high %v412_v15, %v411_v51, %v3720_v63  ;;  %v493_v4 = vshll.u32 %v3430_v5, %v3680_v17  ;;  %v3727_v56 = vshrl.u32 %v582_v53, 5 }
 0x158   :  { %v2686_v59 = vmin.u32 %v327_v46, %v3698_v6  ;;  %v403_v7 = vsel %vm397_vm13, %v400_v41, %v402_v47  ;;  %v494_v10 = vshrl.u32 %v3431_v9, %v3701_v36  ;;  %v596_v11 = vshll.u32 %v3430_v5, %v3674_v62 }
 0x159   :  { %v601_v13 = vor.u32 %v600_v37, %v599_v50  ;;  %v3736_v14 = vshrl.u32 %v3432_v12, %v3701_v36  ;;  %v422_v42 = vadd.s32 1, %v3714_v57  ;;  %v588_v43 = vshrl.u32 %v3428_v60, %v3683_v18 }
 0x15a   :  { %v329_v8 = vclz %v2686_v59  ;;  %v591_v52 = vshrl.u32 %v3429_v2, %v3683_v18  ;;  %v598_v21 = vor.u32 %v597_v61, %v596_v11  ;;  %v419_v23 = vmul.u32 %v412_v15, %v403_v7 }
 0x15b   :  { %vm421_vm14 = vc.u32 %v3721_v1, %v3713_v54  ;;  %vm605_vm15 = vcmp.lt.s32.totalorder %v3727_v56, 4  ;;  %v587_v12 = vshll.u32 %v3427_v58, %v3674_v62  ;;  %v590_v27 = vshll.u32 %v3428_v60, %v3674_v62 }
 0x15c   :  { %v2687_v53 = vadd.s32 4294967294, %v329_v8  ;;  %v423_v24 = vsel %vm421_vm14, %v422_v42, %v3714_v57  ;;  %v615_v29 = vsel %vm605_vm15, %v601_v13, 1326507024  ;;  %v594_v15 = vshrl.u32 %v3430_v5, %v3683_v18 }
 0x15d   :  { %v424_v31 = vadd.s32 %v423_v24, %v419_v23  ;;  %v589_v35 = vor.u32 %v588_v43, %v587_v12  ;;  %v592_v37 = vor.u32 %v591_v52, %v590_v27  ;;  %v593_v38 = vshll.u32 %v3429_v2, %v3674_v62 }
 0x15e   :  { %vm2688_vm1 = vcmp.lt.s32.totalorder %v2687_v53, 0  ;;  %v611_v45 = vsel %vm605_vm15, %v598_v21, 920167782  ;;  %v578_v47 = vor.u32 8388608, %v3690_v25  ;;  %vm602_vm2 = vcmp.lt.s32.totalorder %v3727_v56, 1 }
 0x15f   :  { %v332_v33 = vsel %vm2688_vm1, 0, %v2687_v53  ;;  %v425_v46 = vadd.s32 536870912, %v424_v31  ;;  %v595_v48 = vor.u32 %v594_v15, %v593_v38  ;;  %vm604_vm3 = vcmp.lt.s32.totalorder %v3727_v56, 3 }
 0x160   :  { %v333_v41 = vsub.s32 32, %v332_v33  ;;  %v337_v40 = vsub.s32 4294967266, %v332_v33  ;;  %v616_v62 = vsel %vm604_vm3, %v598_v21, %v615_v29  ;;  %v3766_v57 = vor.u32 %v494_v10, %v493_v4 }
 0x161   :  { %v3762_v51 = vshrl.u32 %v425_v46, 30  ;;  %v610_v59 = vsel %vm602_vm2, %v589_v35, %v592_v37  ;;  %v612_v25 = vsel %vm604_vm3, %v595_v48, %v611_v45  ;;  %v614_v61 = vsel %vm602_vm2, %v592_v37, %v595_v48 }
 0x162   :  { %v335_v49 = vshrl.u32 %v317_v3, %v333_v41  ;;  %v338_v50 = vadd.s32 127, %v337_v40  ;;  %v334_v63 = vshll.u32 %v3698_v6, %v332_v33  ;;  %vm603_vm4 = vcmp.lt.s32.totalorder %v3727_v56, 2 }
 0x163   :  { %v427_v7 = vshll.u32 %v3762_v51, 30  ;;  %v586_v4 = vshrl.u32 %v3427_v58, %v3683_v18  ;;  %v607_v8 = vsel %vm605_vm15, %v595_v48, 2102212464  ;;  %v617_v10 = vsel %vm603_vm4, %v614_v61, %v616_v62 }
 0x164   :  { %v339_v3 = vshll.u32 %v338_v50, 23  ;;  %v618_v11 = vshll.u32 %v578_v47, 8  ;;  %v336_v13 = vor.u32 %v335_v49, %v334_v63  ;;  %v613_v6 = vsel %vm603_vm4, %v610_v59, %v612_v25 }
 0x165   :  { %v3783_v43 = vsub.s32 %v424_v31, %v427_v7  ;;  %v496_v52 = vshll.u32 %v3431_v9, %v3680_v17  ;;  %v467_v18 = vand.u32 2147483647, %v3619_v34  ;;  %v606_v12 = vsel %vm602_vm2, %v586_v4, %v589_v35 }
 0x166   :  { %v340_v42 = vor.u32 4788187, %v339_v3  ;;  %v3789_v53 = vmul.u32.u64.low %v618_v11, %v617_v10  ;;  %v3790_v21 = vmul.u32.u64.high %v618_v11, %v617_v10, %v3789_v53  ;;  %v608_v27 = vsel %vm604_vm3, %v592_v37, %v607_v8 }
 0x167   :  { %v430_v24 = vsub.s32 0, %v3783_v43  ;;  %vm502_vm5 = vcmp.lt.s32.totalorder %v3695_v32, 4  ;;  %v3799_v29 = vmul.u32.u64.low %v618_v11, %v613_v6  ;;  %v3800_v31 = vmul.u32.u64.high %v618_v11, %v613_v6, %v3799_v29 }
 0x168   :  { %v341_v23 = vand.u32 2147483647, %v340_v42  ;;  %v343_v9 = vcvt.s32.f32 %v336_v13  ;;  %v498_v15 = vor.u32 %v3736_v14, %v496_v52  ;;  %v508_v33 = vsel %vm502_vm5, %v3766_v57, 920167782 }
 0x169   :  { %v2690_v38 = vmin.u32 %v430_v24, %v3783_v43  ;;  %v609_v35 = vsel %vm603_vm4, %v606_v12, %v608_v27  ;;  %v474_v37 = vand.u32 8388607, %v467_v18  ;;  %v484_v41 = vshll.u32 %v3427_v58, %v3680_v17 }
 0x16a   :  { %v485_v40 = vshrl.u32 %v3428_v60, %v3701_v36  ;;  %vm263_vm6 = vcmp.lt.s32.totalorder %v3612_v26, 0  ;;  %v344_v14 = vmul.f32 %v343_v9, %v341_v23  ;;  %vm627_vm7 = vc.u32 %v3790_v21, %v3799_v29 }
 0x16b   :  { %v432_v45 = vclz %v2690_v38  ;;  %v488_v56 = vshrl.u32 %v3429_v2, %v3701_v36  ;;  %v628_v46 = vadd.s32 1, %v3800_v31  ;;  %v487_v47 = vshll.u32 %v3428_v60, %v3680_v17 }
 0x16c   :  { %v490_v48 = vshll.u32 %v3429_v2, %v3680_v17  ;;  %v491_v49 = vshrl.u32 %v3430_v5, %v3701_v36  ;;  %v512_v50 = vsel %vm502_vm5, %v498_v15, 1326507024  ;;  %v420_v62 = vadd.s32 %v3713_v54, %v3721_v1 }
 0x16d   :  { %v2691_v59 = vadd.s32 4294967294, %v432_v45  ;;  %v625_v25 = vmul.u32 %v618_v11, %v609_v35  ;;  %vm3834_vm8 = vcmp.le.f32.partialorder %v261_v28, 0.7853982  ;;  %v629_v60 = vsel %vm627_vm7, %v628_v46, %v3800_v31 }
 0x16e   :  { %v486_v2 = vor.u32 %v485_v40, %v484_v41  ;;  %v489_v17 = vor.u32 %v488_v56, %v487_v47  ;;  %v492_v63 = vor.u32 %v491_v49, %v490_v48  ;;  %v475_v3 = vor.u32 8388608, %v474_v37 }
 0x16f   :  { %vm2692_vm9 = vcmp.lt.s32.totalorder %v2691_v59, 0  ;;  %v630_v5 = vadd.s32 %v629_v60, %v625_v25  ;;  %v483_v7 = vshrl.u32 %v3427_v58, %v3701_v36  ;;  %v345_v54 = vxor.u32 2147483648, %v344_v14 }
 0x170   :  { %v435_v1 = vsel %vm2692_vm9, 0, %v2691_v59  ;;  %vm499_vm10 = vcmp.lt.s32.totalorder %v3695_v32, 1  ;;  %vm500_vm11 = vcmp.lt.s32.totalorder %v3695_v32, 2  ;;  %vm501_vm12 = vcmp.lt.s32.totalorder %v3695_v32, 3 }
 0x171   :  { %v436_v28 = vsub.s32 32, %v435_v1  ;;  %v440_v4 = vsub.s32 4294967266, %v435_v1  ;;  %v631_v8 = vadd.s32 536870912, %v630_v5  ;;  %v437_v10 = vshll.u32 %v3783_v43, %v435_v1 }
 0x172   :  { %v504_v11 = vsel %vm502_vm5, %v492_v63, 2102212464  ;;  %v507_v13 = vsel %vm499_vm10, %v486_v2, %v489_v17  ;;  %v509_v58 = vsel %vm501_vm12, %v492_v63, %v508_v33  ;;  %v511_v52 = vsel %vm499_vm10, %v489_v17, %v492_v63 }
 0x173   :  { %v438_v36 = vshrl.u32 %v420_v62, %v436_v28  ;;  %v441_v42 = vadd.s32 127, %v440_v4  ;;  %v3851_v6 = vshrl.u32 %v631_v8, 30  ;;  %v346_v53 = vsel %vm263_vm6, %v345_v54, %v344_v14 }
 0x174   :  { %v510_v43 = vsel %vm500_vm11, %v507_v13, %v509_v58  ;;  %v513_v23 = vsel %vm501_vm12, %v3766_v57, %v512_v50  ;;  %v515_v24 = vshll.u32 %v475_v3, 8  ;;  %v503_v9 = vsel %vm499_vm10, %v483_v7, %v486_v2 }
 0x175   :  { %v439_v12 = vor.u32 %v438_v36, %v437_v10  ;;  %v442_v27 = vshll.u32 %v441_v42, 23  ;;  %v633_v31 = vshll.u32 %v3851_v6, 30  ;;  %v505_v15 = vsel %vm501_vm12, %v489_v17, %v504_v11 }
 0x176   :  { %v514_v33 = vsel %vm500_vm11, %v511_v52, %v513_v23  ;;  %v3869_v38 = vmul.u32.u64.low %v515_v24, %v510_v43  ;;  %v3870_v35 = vmul.u32.u64.high %v515_v24, %v510_v43, %v3869_v38  ;;  %v349_v57 = vsel %vm3834_vm8, %v3612_v26, %v346_v53 }
 0x177   :  { %v443_v37 = vor.u32 4788187, %v442_v27  ;;  %v634_v41 = vsub.s32 %v630_v5, %v633_v31  ;;  %v3876_v40 = vmul.u32.u64.low %v515_v24, %v514_v33  ;;  %v3877_v14 = vmul.u32.u64.high %v515_v24, %v514_v33, %v3876_v40 }
 0x178   :  { %v446_v56 = vcvt.s32.f32 %v439_v12  ;;  %v506_v47 = vsel %vm500_vm11, %v503_v9, %v505_v15  ;;  %3164 = vcosq.f32 %v349_v57  ;;  %v525_v48 = vadd.s32 1, %v3870_v35 }
 0x179   :  { %v444_v45 = vand.u32 2147483647, %v443_v37  ;;  %v636_v46 = vsub.s32 0, %v634_v41  ;;  %3166 = vsinq.f32 %v349_v57  ;;  %v522_v62 = vmul.u32 %v515_v24, %v506_v47  ;;  %v4069_v57 = vld [vmem:[%s4964_s8 + $0x150] sm:$0xff] }
 0x17a   :  { %vm524_vm13 = vc.u32 %v3877_v14, %v3869_v38  ;;  %vm366_vm14 = vcmp.lt.s32.totalorder %v3616_v30, 0  ;;  %vm3888_vm15 = vcmp.le.f32.partialorder %v364_v44, 0.7853982  ;;  %v347_v63 = vsub.s32 4, %v3678_v16  ;;  %5028 = vst [vmem:[#allocation31_spill] sm:$0xff] %v4069_v57 }
 0x17b   :  { %v447_v49 = vmul.f32 %v446_v56, %v444_v45  ;;  %v2698_v50 = vmin.u32 %v636_v46, %v634_v41  ;;  %v526_v60 = vsel %vm524_vm13, %v525_v48, %v3870_v35  ;;  %v450_v3 = vsub.s32 4, %v3762_v51 }
 0x17c   :  { %v527_v2 = vadd.s32 %v526_v60, %v522_v62  ;;  %v348_v28 = vsel %vm263_vm6, %v347_v63, %v3678_v16  ;;  %v626_v4 = vadd.s32 %v3799_v29, %v3790_v21  ;;  %vm353_vm2 = vweird.f32 %v3612_v26  ;;  %v3963_v26 = vld [vmem:[%s4964_s8 + $0x70] sm:$0xff] }
 0x17d   :  { %v448_v59 = vxor.u32 2147483648, %v447_v49  ;;  %v638_v25 = vclz %v2698_v50  ;;  %v451_v11 = vsel %vm366_vm14, %v450_v3, %v3762_v51  ;;  %v350_v52 = vsel %vm3834_vm8, 0, %v348_v28  ;;  %v3953_v28 = vld [vmem:[%s4964_s8 + $0xf0] sm:$0xff] }
 0x17e   :  { %v528_v54 = vadd.s32 536870912, %v527_v2  ;;  %v453_v21 = vsel %vm3888_vm15, 0, %v451_v11  ;;  %v354_v51 = vand.u32 3, %v350_v52  ;;  %vm3921_vm4 = vcmp.le.f32.partialorder %v570_v55, 0.7853982  ;;  %v3995_v52 = vld [vmem:[%s4964_s8 + $0x168] sm:$0xff] }
 0x17f   :  { %v449_v17 = vsel %vm366_vm14, %v448_v59, %v447_v49  ;;  %v2699_v5 = vadd.s32 4294967294, %v638_v25  ;;  %v457_v27 = vand.u32 3, %v453_v21  ;;  %vm572_vm5 = vcmp.lt.s32.totalorder %v3623_v39, 0  ;;  %5022 = vst [vmem:[#allocation25_spill] sm:$0xff] %v3995_v52  ;;  %v4014_v21 = vld [vmem:[%s4964_s8 + $0x60] sm:$0xff] }
 0x180   :  { %v452_v7 = vsel %vm3888_vm15, %v3616_v30, %v449_v17  ;;  %v3899_v1 = vshrl.u32 %v528_v54, 30  ;;  %vm355_vm3 = vcmp.lt.s32.totalorder %v354_v51, 2  ;;  %vm356_vm7 = vcmp.eq.s32.totalorder %v354_v51, 0 }
 0x181   :  { %3168 = vcosq.f32 %v452_v7  ;;  %vm2700_vm1 = vcmp.lt.s32.totalorder %v2699_v5, 0  ;;  %vm458_vm6 = vcmp.lt.s32.totalorder %v457_v27, 2  ;;  %vm359_vm8 = vcmp.eq.s32.totalorder %v354_v51, 2  ;;  %v4028_v51 = vld [vmem:[%s4964_s8 + $0xd8] sm:$0xff] }
 0x182   :  { %3170 = vsinq.f32 %v452_v7  ;;  %v641_v44 = vsel %vm2700_vm1, 0, %v2699_v5  ;;  %v530_v13 = vshll.u32 %v3899_v1, 30  ;;  %vm459_vm9 = vcmp.eq.s32.totalorder %v457_v27, 0  ;;  %v3945_v7 = vld [vmem:[%s4964_s8 + $0x178] sm:$0xff] }
 0x183   :  { %v642_v8 = vsub.s32 32, %v641_v44  ;;  %v646_v10 = vsub.s32 4294967266, %v641_v44  ;;  %v643_v58 = vshll.u32 %v634_v41, %v641_v44  ;;  %vm462_vm10 = vcmp.eq.s32.totalorder %v457_v27, 2  ;;  %v4040_v27 = vld [vmem:[%s4964_s8 + $0x58] sm:$0xff] }
 0x184   :  { %v3912_v53 = vsub.s32 %v527_v2, %v530_v13  ;;  %v523_v62 = vadd.s32 %v3869_v38, %v3877_v14  ;;  %vm456_vm12 = vweird.f32 %v3616_v30  ;;  %v656_v3 = vsub.s32 4, %v3851_v6  ;;  %v3940_v14 = vld [vmem:[%s4964_s8 + $0x78] sm:$0xff]  ;;  %v3975_v13 = vld [vmem:[%s4964_s8 + $0xe8] sm:$0xff] }
 0x185   :  { %v644_v36 = vshrl.u32 %v626_v4, %v642_v8  ;;  %v647_v42 = vadd.s32 127, %v646_v10  ;;  %v3165_v16 = vpop.eup %3164  ;;  %v3958_v4 = vld [vmem:[%s4964_s8 + $0x1f0] sm:$0xff]  ;;  %vm469_vm13 = vcmp.lt.s32.totalorder %v3619_v34, 0  ;;  %vm4098_vm14 = vcmp.le.f32.partialorder %v467_v18, 0.7853982 }
 0x186   :  { %v3167_v23 = vpop.eup %3166  ;;  %v533_v24 = vsub.s32 0, %v3912_v53  ;;  %v360_v15 = vxor.u32 2147483648, %v3165_v16  ;;  %v3968_v8 = vld [vmem:[%s4964_s8 + $0x170] sm:$0xff] }
 0x187   :  { %v645_v29 = vor.u32 %v644_v36, %v643_v58  ;;  %v648_v43 = vshll.u32 %v647_v42, 23  ;;  %v357_v9 = vxor.u32 2147483648, %v3167_v23  ;;  %v3980_v58 = vld [vmem:[%s4964_s8 + $0x1e8] sm:$0xff]  ;;  %v657_v36 = vsel %vm572_vm5, %v656_v3, %v3851_v6  ;;  %v4002_v6 = vld [vmem:[%s4964_s8 + $0xe0] sm:$0xff] }
 0x188   :  { %v2694_v31 = vmin.u32 %v533_v24, %v3912_v53  ;;  %v361_v47 = vsel %vm359_vm8, %v360_v15, %v3167_v23  ;;  %5021 = vst [vmem:[#allocation24_spill] sm:$0xff] %v3980_v58  ;;  %v3990_v42 = vld [vmem:[%s4964_s8 + $0x68] sm:$0xff]  ;;  %v4052_v15 = vld [vmem:[%s4964_s8 + $0xd0] sm:$0xff]  ;;  %vm2286_vm8 = vcmask 31744  }
 0x189   :  { %v649_v12 = vor.u32 4788187, %v648_v43  ;;  %v652_v33 = vcvt.s32.f32 %v645_v29  ;;  %v358_v46 = vsel %vm356_vm7, %v3165_v16, %v357_v9  ;;  %v4007_v16 = vld [vmem:[%s4964_s8 + $0x1e0] sm:$0xff]  ;;  %v659_v43 = vsel %vm3921_vm4, 0, %v657_v36 }
 0x18a   :  { %v535_v35 = vclz %v2694_v31  ;;  %v362_v60 = vsel %vm355_vm3, %v358_v46, %v361_v47  ;;  %5023 = vst [vmem:[#allocation26_spill] sm:$0xff] %v4007_v16  ;;  %v4019_v29 = vld [vmem:[%s4964_s8 + $0x160] sm:$0xff]  ;;  %v4045_v31 = vld [vmem:[%s4964_s8 + $0x158] sm:$0xff]  ;;  %v4094_v46 = vld [vmem:[%s4964_s8 + $0x148] sm:$0xff]  ;;  %vm662_vm3 = vweird.f32 %v3623_v39  ;;  %vm559_vm7 = vweird.f32 %v3619_v34 }
 0x18b   :  { %v650_v61 = vand.u32 2147483647, %v649_v12  ;;  %v363_v30 = vsel %vm353_vm2, nan, %v362_v60  ;;  %5024 = vst [vmem:[#allocation27_spill] sm:$0xff] %v4019_v29  ;;  %v4033_v12 = vld [vmem:[%s4964_s8 + $0x1d8] sm:$0xff]  ;;  %5026 = vst [vmem:[#allocation29_spill] sm:$0xff] %v4045_v31 }
 0x18c   :  { %v2695_v40 = vadd.s32 4294967294, %v535_v35  ;;  %5025 = vst [vmem:[#allocation28_spill] sm:$0xff] %v4033_v12  ;;  %v4064_v35 = vld [vmem:[%s4964_s8 + $0x50] sm:$0xff]  ;;  %5030 = vst [vmem:[#allocation33_spill] sm:$0xff] %v4094_v46  ;;  %v4129_v60 = vld [vmem:[%s4964_s8 + $0x140] sm:$0xff] }
 0x18d   :  { %v653_v37 = vmul.f32 %v652_v33, %v650_v61  ;;  %v4057_v61 = vld [vmem:[%s4964_s8 + $0x1d0] sm:$0xff]  ;;  %v663_v33 = vand.u32 3, %v659_v43  ;;  %5034 = vst [vmem:[#allocation35_spill] sm:$0xff] %v4129_v60  ;;  %v4194_v43 = vld [vmem:[%s4964_s8 + $0x1a8] sm:$0xff] }
 0x18e   :  { %v3169_v41 = vpop.eup %3168  ;;  %vm2696_vm11 = vcmp.lt.s32.totalorder %v2695_v40, 0  ;;  %5027 = vst [vmem:[#allocation30_spill] sm:$0xff] %v4057_v61  ;;  %5039 = vst [vmem:[#allocation40_spill] sm:$0xff] %v4194_v43 }
 0x18f   :  { %v3171_v45 = vpop.eup %3170  ;;  %v463_v56 = vxor.u32 2147483648, %v3169_v41  ;;  %v654_v48 = vxor.u32 2147483648, %v653_v37  ;;  %v538_v59 = vsel %vm2696_vm11, 0, %v2695_v40  ;;  %v4081_v40 = vld [vmem:[%s4964_s8 + $0x1c8] sm:$0xff]  ;;  %vm668_vm15 = vcmp.eq.s32.totalorder %v663_v33, 2 }
 0x190   :  { %v460_v49 = vxor.u32 2147483648, %v3171_v45  ;;  %v539_v32 = vsub.s32 32, %v538_v59  ;;  %v543_v63 = vsub.s32 4294967266, %v538_v59  ;;  %v540_v54 = vshll.u32 %v3912_v53, %v538_v59  ;;  %5029 = vst [vmem:[#allocation32_spill] sm:$0xff] %v4081_v40 }
 0x191   :  { %v464_v55 = vsel %vm462_vm10, %v463_v56, %v3171_v45  ;;  %v655_v50 = vsel %vm572_vm5, %v654_v48, %v653_v37  ;;  %v4089_v56 = vld [vmem:[%s4964_s8 + $0x48] sm:$0xff]  ;;  %vm665_vm1 = vcmp.eq.s32.totalorder %v663_v33, 0  ;;  %vm664_vm2 = vcmp.lt.s32.totalorder %v663_v33, 2 }
 0x192   :  { %v461_v25 = vsel %vm459_vm9, %v3169_v41, %v460_v49  ;;  %v658_v2 = vsel %vm3921_vm4, %v3623_v39, %v655_v50  ;;  %v541_v38 = vshrl.u32 %v523_v62, %v539_v32  ;;  %v544_v44 = vadd.s32 127, %v543_v63  ;;  %v4076_v41 = vld [vmem:[%s4964_s8 + $0xc8] sm:$0xff]  ;;  %v4109_v50 = vld [vmem:[%s4964_s8 + $0xc0] sm:$0xff]  ;;  %v4136_v32 = vld [vmem:[%s4964_s8 + $0xb8] sm:$0xff] }
 0x193   :  { %v465_v17 = vsel %vm458_vm6, %v461_v25, %v464_v55  ;;  %3172 = vcosq.f32 %v658_v2  ;;  %v4114_v62 = vld [vmem:[%s4964_s8 + $0x1c0] sm:$0xff]  ;;  %v4164_v39 = vld [vmem:[%s4964_s8 + $0xb0] sm:$0xff] }
 0x194   :  { %v466_v5 = vsel %vm456_vm12, nan, %v465_v17  ;;  %3174 = vsinq.f32 %v658_v2  ;;  %v542_v10 = vor.u32 %v541_v38, %v540_v54  ;;  %v545_v11 = vshll.u32 %v544_v44, 23  ;;  %5033 = vst [vmem:[#allocation34_spill] sm:$0xff] %v4114_v62  ;;  %v4124_v25 = vld [vmem:[%s4964_s8 + $0x40] sm:$0xff]  ;;  %v4141_v17 = vld [vmem:[%s4964_s8 + $0x1b8] sm:$0xff]  ;;  %v4169_v44 = vld [vmem:[%s4964_s8 + $0x1b0] sm:$0xff] }
 0x195   :  { %1027 = vmatprep.mubr.f32.mxu1 %v466_v5  ;;  %1104 = vmatprep.mubr.f32.mxu0 %v466_v5  ;;  %5035 = vst [vmem:[#allocation36_spill] sm:$0xff] %v4141_v17  ;;  %v553_v5 = vsub.s32 4, %v3899_v1  ;;  %v4152_v38 = vld [vmem:[%s4964_s8 + $0x38] sm:$0xff]  ;;  %5037 = vst [vmem:[#allocation38_spill] sm:$0xff] %v4169_v44 }
 0x196   :  { %1028 = vmatmul.mubr.f32.vlgmr.msra.gmra.mxu1 %v363_v30  ;;  %1105 = vmatmul.mubr.f32.vlgmr.msra.gmra.mxu0 %v363_v30  ;;  %v546_v53 = vor.u32 4788187, %v545_v11  ;;  %v549_v24 = vcvt.s32.f32 %v542_v10  ;;  %v4157_v30 = vld [vmem:[%s4964_s8 + $0x138] sm:$0xff]  ;;  %v4174_v10 = vld [vmem:[%s4964_s8 + $0x30] sm:$0xff] }
 0x197   :  { %2724 = vmatpush3.msra.mxu1 %v3940_v14  ;;  %2762 = vmatpush3.msra.mxu0 %v3945_v7  ;;  %5036 = vst [vmem:[#allocation37_spill] sm:$0xff] %v4157_v30  ;;  %v4179_v11 = vld [vmem:[%s4964_s8 + $0x130] sm:$0xff]  ;;  %v554_v36 = vsel %vm469_vm13, %v553_v5, %v3899_v1  ;;  %v4201_v1 = vld [vmem:[%s4964_s8 + $0x28] sm:$0xff] }
 0x198   :  { %2725 = vmatprep.subr.mxu1 %v3953_v28  ;;  %2763 = vmatprep.subr.mxu0 %v3958_v4  ;;  %v547_v23 = vand.u32 2147483647, %v546_v53  ;;  %5038 = vst [vmem:[#allocation39_spill] sm:$0xff] %v4179_v11  ;;  %v4189_v53 = vld [vmem:[%s4964_s8 + $0xa8] sm:$0xff]  ;;  %v556_v33 = vsel %vm4098_vm14, 0, %v554_v36  ;;  %v4260_v36 = vld [vmem:[%s4964_s8 + $0x118] sm:$0xff] }
 0x199   :  { %2726 = vmatpush3.msra.mxu1 %v3963_v26  ;;  %2764 = vmatpush3.msra.mxu0 %v3968_v8  ;;  %5044 = vst [vmem:[#allocation45_spill] sm:$0xff] %v4260_v36 }
 0x19a   :  { %2727 = vmatprep.subr.mxu1 %v3975_v13  ;;  %2765 = vmatprep.subr.mxu0 %v3980_v58  ;;  %v550_v9 = vmul.f32 %v549_v24, %v547_v23  ;;  %v4206_v23 = vld [vmem:[%s4964_s8 + $0x128] sm:$0xff]  ;;  %v4213_v24 = vld [vmem:[%s4964_s8 + $0xa0] sm:$0xff] }
 0x19b   :  { %2728 = vmatpush3.msra.mxu1 %v3990_v42  ;;  %2766 = vmatpush3.msra.mxu0 %v3995_v52  ;;  %5040 = vst [vmem:[#allocation41_spill] sm:$0xff] %v4206_v23 }
 0x19c   :  { %2729 = vmatprep.subr.mxu1 %v4002_v6  ;;  %2767 = vmatprep.subr.mxu0 %v4007_v16  ;;  %v551_v37 = vxor.u32 2147483648, %v550_v9 }
 0x19d   :  { %2730 = vmatpush3.msra.mxu1 %v4014_v21  ;;  %2768 = vmatpush3.msra.mxu0 %v4019_v29 }
 0x19e   :  { %2731 = vmatprep.subr.mxu1 %v4028_v51  ;;  %2769 = vmatprep.subr.mxu0 %v4033_v12  ;;  %v552_v55 = vsel %vm469_vm13, %v551_v37, %v550_v9  ;;  %v4218_v9 = vld [vmem:[%s4964_s8 + $0x1a0] sm:$0xff] }
 0x19f   :  { %2732 = vmatpush3.msra.mxu1 %v4040_v27  ;;  %2770 = vmatpush3.msra.mxu0 %v4045_v31  ;;  %v555_v59 = vsel %vm4098_vm14, %v3619_v34, %v552_v55  ;;  %5041 = vst [vmem:[#allocation42_spill] sm:$0xff] %v4218_v9  ;;  %v4227_v37 = vld [vmem:[%s4964_s8 + $0x20] sm:$0xff]  ;;  %v4255_v34 = vld [vmem:[%s4964_s8 + $0x18] sm:$0xff] }
 0x1a0   :  { %v3173_v45 = vpop.eup %3172  ;;  %2733 = vmatprep.subr.mxu1 %v4052_v15  ;;  %2771 = vmatprep.subr.mxu0 %v4057_v61  ;;  %3176 = vcosq.f32 %v555_v59 }
 0x1a1   :  { %v3175_v47 = vpop.eup %3174  ;;  %v669_v48 = vxor.u32 2147483648, %v3173_v45  ;;  %2734 = vmatpush3.msra.mxu1 %v4064_v35  ;;  %2772 = vmatpush3.msra.mxu0 %v4069_v57  ;;  %3178 = vsinq.f32 %v555_v59 }
 0x1a2   :  { %v666_v18 = vxor.u32 2147483648, %v3175_v47  ;;  %2735 = vmatprep.subr.mxu1 %v4076_v41  ;;  %2773 = vmatprep.subr.mxu0 %v4081_v40 }
 0x1a3   :  { %v670_v2 = vsel %vm668_vm15, %v669_v48, %v3175_v47  ;;  %2736 = vmatpush3.msra.mxu1 %v4089_v56  ;;  %2774 = vmatpush3.msra.mxu0 %v4094_v46  ;;  %v560_v47 = vand.u32 3, %v556_v33  ;;  %v4267_v33 = vld [vmem:[%s4964_s8 + $0x90] sm:$0xff] }
 0x1a4   :  { %v667_v63 = vsel %vm665_vm1, %v3173_v45, %v666_v18  ;;  %2737 = vmatprep.subr.mxu1 %v4109_v50  ;;  %2775 = vmatprep.subr.mxu0 %v4114_v62  ;;  %v4232_v45 = vld [vmem:[%s4964_s8 + $0x120] sm:$0xff] }
 0x1a5   :  { %v671_v3 = vsel %vm664_vm2, %v667_v63, %v670_v2  ;;  %2738 = vmatpush3.msra.mxu1 %v4124_v25  ;;  %2776 = vmatpush3.msra.mxu0 %v4129_v60  ;;  %5042 = vst [vmem:[#allocation43_spill] sm:$0xff] %v4232_v45  ;;  %vm565_vm4 = vcmp.eq.s32.totalorder %v560_v47, 2  ;;  %vm562_vm5 = vcmp.eq.s32.totalorder %v560_v47, 0  ;;  %vm561_vm6 = vcmp.lt.s32.totalorder %v560_v47, 2  ;;  %v4272_v47 = vld [vmem:[%s4964_s8 + $0x190] sm:$0xff] }
 0x1a6   :  { %v672_v54 = vsel %vm662_vm3, nan, %v671_v3  ;;  %2739 = vmatprep.subr.mxu1 %v4136_v32  ;;  %2777 = vmatprep.subr.mxu0 %v4141_v17  ;;  %v4244_v3 = vld [vmem:[%s4964_s8 + $0x98] sm:$0xff]  ;;  %5045 = vst [vmem:[#allocation46_spill] sm:$0xff] %v4272_v47 }
 0x1a7   :  { %1033 = vmatprep.mubr.f32.mxu1 %v672_v54  ;;  %1110 = vmatprep.mubr.f32.mxu0 %v672_v54  ;;  %v4250_v54 = vld [vmem:[%s4964_s8 + $0x198] sm:$0xff] }
 0x1a8   :  { %2740 = vmatpush3.msra.mxu1 %v4152_v38  ;;  %2778 = vmatpush3.msra.mxu0 %v4157_v30  ;;  %5043 = vst [vmem:[#allocation44_spill] sm:$0xff] %v4250_v54 }
 0x1a9   :  { %2741 = vmatprep.subr.mxu1 %v4164_v39  ;;  %2779 = vmatprep.subr.mxu0 %v4169_v44 }
 0x1aa   :  { %2742 = vmatpush3.msra.mxu1 %v4174_v10  ;;  %2780 = vmatpush3.msra.mxu0 %v4179_v11  ;;  %v4347_v11 = vsub.s32 2, %v3602_v19 }
 0x1ab   :  { %2743 = vmatprep.subr.mxu1 %v4189_v53  ;;  %2781 = vmatprep.subr.mxu0 %v4194_v43 }
 0x1ac   :  { %2744 = vmatpush3.msra.mxu1 %v4201_v1  ;;  %2782 = vmatpush3.msra.mxu0 %v4206_v23  ;;  %v4344_v23 = vsub.s32 3, %v3602_v19 }
 0x1ad   :  { %2745 = vmatprep.subr.mxu1 %v4213_v24  ;;  %2783 = vmatprep.subr.mxu0 %v4218_v9  ;;  %v3177_v48 = vpop.eup %3176 }
 0x1ae   :  { %2746 = vmatpush3.msra.mxu1 %v4227_v37  ;;  %2784 = vmatpush3.msra.mxu0 %v4232_v45  ;;  %v3179_v49 = vpop.eup %3178  ;;  %v566_v55 = vxor.u32 2147483648, %v3177_v48 }
 0x1af   :  { %v563_v18 = vxor.u32 2147483648, %v3179_v49  ;;  %2747 = vmatprep.subr.mxu1 %v4244_v3  ;;  %2785 = vmatprep.subr.mxu0 %v4250_v54 }
 0x1b0   :  { %v567_v59 = vsel %vm565_vm4, %v566_v55, %v3179_v49  ;;  %2748 = vmatpush3.msra.mxu1 %v4255_v34  ;;  %2786 = vmatpush3.msra.mxu0 %v4260_v36  ;;  %v4284_v49 = vld [vmem:[%s4964_s8 + $0x110] sm:$0xff]  ;;  %v4292_v55 = vld [vmem:[%s4964_s8 + $0x88] sm:$0xff] }
 0x1b1   :  { %v564_v2 = vsel %vm562_vm5, %v3177_v48, %v563_v18  ;;  %v4277_v48 = vld [vmem:[%s4964_s8 + $0x10] sm:$0xff]  ;;  %2749 = vmatprep.subr.mxu1 %v4267_v33  ;;  %5046 = vst [vmem:[#allocation47_spill] sm:$0xff] %v4284_v49  ;;  %2787 = vmatprep.subr.mxu0 %v4272_v47  ;;  %v4297_v18 = vld [vmem:[%s4964_s8 + $0x188] sm:$0xff]  ;;  %v875_v47 = vpop.f32.mrf.mxu1 }
 0x1b2   :  { %v568_v63 = vsel %vm561_vm6, %v564_v2, %v567_v59  ;;  %2750 = vmatpush3.msra.mxu1 %v4277_v48  ;;  %2788 = vmatpush3.msra.mxu0 %v4284_v49  ;;  %5047 = vst [vmem:[#allocation48_spill] sm:$0xff] %v4297_v18  ;;  %v4302_v59 = vld [vmem:[%s4964_s8 + $0x8] sm:$0xff]  ;;  %v3220_v49 = vld [vmem:[%s4964_s8 + $0xf8] sm:$0xff] }
 0x1b3   :  { %v569_v5 = vsel %vm559_vm7, nan, %v568_v63  ;;  %2751 = vmatprep.subr.mxu1 %v4292_v55  ;;  %2789 = vmatprep.subr.mxu0 %v4297_v18  ;;  %v4309_v2 = vld [vmem:[%s4964_s8 + $0x108] sm:$0xff]  ;;  %v4316_v63 = vld [vmem:[%s4964_s8 + $0x80] sm:$0xff]  ;;  %v4337_v18 = vld [vmem:[#allocation11 + $0x28] sm:$0xff]  ;;  %v877_v36 = vpop.f32.mrf.mxu1 }
 0x1b4   :  { %1034 = vmatmul.mubr.f32.gmra.mxu1 %v569_v5  ;;  %1111 = vmatmul.mubr.f32.gmra.mxu0 %v569_v5  ;;  %5048 = vst [vmem:[#allocation49_spill] sm:$0xff] %v4309_v2  ;;  %v4321_v5 = vld [vmem:[%s4964_s8 + $0x180] sm:$0xff] }
 0x1b5   :  { %2752 = vmatpush3.msra.mxu1 %v4302_v59  ;;  %2790 = vmatpush3.msra.mxu0 %v4309_v2  ;;  %5049 = vst [vmem:[#allocation50_spill] sm:$0xff] %v4321_v5  ;;  %v4333_v2 = vld [vmem:[%s4964_s8 + $0x100] sm:$0xff]  ;;  %v881_v45 = vpop.f32.mrf.mxu1 }
 0x1b6   :  { %2753 = vmatprep.subr.mxu1 %v4316_v63  ;;  %2791 = vmatprep.subr.mxu0 %v4321_v5  ;;  %5050 = vst [vmem:[#allocation51_spill] sm:$0xff] %v4333_v2  ;;  %v952_v5 = vpop.f32.mrf.mxu0 }
 0x1b7   :  { %2754 = vmatpush3.msra.mxu1 %v4326_v0  ;;  %2792 = vmatpush3.msra.mxu0 %v4333_v2  ;;  %v883_v43 = vpop.f32.mrf.mxu1 }
 0x1b8   :  { %2799 = vmatprep.subr.mxu1 %v3220_v49  ;;  %1405 = vmatprep.subr.mxu0 %v4337_v18  ;;  %v954_v54 = vpop.f32.mrf.mxu0  ;;  %v1117_v49 = vld [vmem:[%s4961_s5] sm:$0xf]  ;;  %s2667_s5 = sshll.u32 %s3433_s25, 4  ;;  %s2668_s5 = int_to_ptr.vmem [resolvable:$true] %s2667_s5 }
 0x1b9   :  { %v1126_v17 = vrot.slane %v1117_v49, %v3608_v22  ;;  %v1134_v60 = vrot.slane %v1117_v49, %v4344_v23  ;;  %v1122_v46 = vrot.slane %v1117_v49, %v3605_v20  ;;  %v1130_v57 = vrot.slane %v1117_v49, %v4347_v11  ;;  %v4364_v22 = vld [vmem:[#allocation11 + $0x20] sm:$0xff]  ;;  %s3382_s4 = scalar_lea.vmem %s2668_s5, 256  ;;  %p3387_p13 = scmp.lt.s32.totalorder %s2668_s5, %s2668_s5 }
 0x1ba   :  { %v958_v9 = vpop.f32.mrf.mxu0  ;;  %v5072_v49 = vld [vmem:[#allocation44_spill] sm:$0xff]  ;;  %p3383_p12 = scmp.ne.s32.totalorder %s2668_s5, %s3382_s4  ;;  %p3388_p0 = scmp.lt.s32.totalorder %s3382_s4, %s3382_s4 }
 0x1bc   :  { %v960_v2 = vpop.f32.mrf.mxu0  ;;  %p3389_p1 = por %p3388_p0, %p3387_p13 }
 0x1be   :  { %p3390_p2 = pnand %p3389_p1, %p3383_p12 }
 0x256   :  { %v1029_v44 = vpop.f32.mrf.mxu1  ;;  %v1106_v30 = vpop.f32.mrf.mxu0 }
 0x257   :  { %v1030_v62 = vadd.f32 %v1029_v44, %v875_v47  ;;  %v1107_v40 = vadd.f32 %v1106_v30, %v952_v5  ;;  %v5064_v47 = vld [vmem:[#allocation36_spill] sm:$0xff]  ;;  %v5071_v5 = vld [vmem:[#allocation43_spill] sm:$0xff] }
 0x258   :  { %v1031_v61 = vpop.f32.mrf.mxu1  ;;  %v1108_v31 = vpop.f32.mrf.mxu0 }
 0x259   :  { %v1032_v19 = vadd.f32 %v1031_v61, %v877_v36  ;;  %v1109_v12 = vadd.f32 %v1108_v31, %v954_v54  ;;  %v4360_v52 = vadd.f32 %v1122_v46, %v1030_v62  ;;  %v4362_v58 = vadd.f32 %v1130_v57, %v1107_v40  ;;  %v5057_v54 = vld [vmem:[#allocation29_spill] sm:$0xff]  ;;  %v5062_v36 = vld [vmem:[#allocation34_spill] sm:$0xff] }
 0x25a   :  { %v5051_v61 = vmov 0.0  }
 0x25b   :  { %v4356_v29 = vadd.f32 %v1126_v17, %v1032_v19  ;;  %v4358_v16 = vadd.f32 %v1134_v60, %v1109_v12  ;;  %v5073_v19 = vld [vmem:[#allocation45_spill] sm:$0xff] }
 0x25d   :  { %1285 = vmatprep.mubr.f32.mxu1 %v4356_v29  ;;  %1360 = vmatprep.mubr.f32.mxu0 %v4358_v16 }
 0x25e   :  { %1286 = vmatmul.mubr.f32.vlgmr.msra.gmra.mxu1 %v4360_v52  ;;  %1361 = vmatmul.mubr.f32.vlgmr.msra.gmra.mxu0 %v4362_v58 }
 0x25f   :  { %1406 = vmatpush1.msra.mxu0 %v4364_v22  ;;  %2800 = vmatpush3.msra.mxu1 %v3940_v14 }
 0x260   :  { %2801 = vmatprep.subr.mxu1 %v3953_v28 }
 0x261   :  { %2802 = vmatpush3.msra.mxu1 %v3963_v26 }
 0x262   :  { %2803 = vmatprep.subr.mxu1 %v3975_v13 }
 0x263   :  { %2804 = vmatpush3.msra.mxu1 %v3990_v42 }
 0x264   :  { %2805 = vmatprep.subr.mxu1 %v4002_v6 }
 0x265   :  { %2806 = vmatpush3.msra.mxu1 %v4014_v21 }
 0x266   :  { %2807 = vmatprep.subr.mxu1 %v4028_v51 }
 0x267   :  { %2808 = vmatpush3.msra.mxu1 %v4040_v27 }
 0x268   :  { %2809 = vmatprep.subr.mxu1 %v4052_v15 }
 0x269   :  { %2810 = vmatpush3.msra.mxu1 %v4064_v35  ;;  %v4416_v35 = vld [vmem:[#allocation11 + $0x8] sm:$0xff] }
 0x26a   :  { %2811 = vmatprep.subr.mxu1 %v4076_v41  ;;  %v4418_v41 = vld [vmem:[#allocation11] sm:$0xff]  ;;  %1407 = vmatprep.subr.mxu0 %v4416_v35 }
 0x26b   :  { %2812 = vmatpush3.msra.mxu1 %v4089_v56  ;;  %1408 = vmatpush1.msra.mxu0 %v4418_v41 }
 0x26c   :  { %2813 = vmatprep.subr.mxu1 %v4109_v50 }
 0x26d   :  { %2814 = vmatpush3.msra.mxu1 %v4124_v25 }
 0x26e   :  { %2815 = vmatprep.subr.mxu1 %v4136_v32  ;;  %v4424_v32 = vld [vmem:[#allocation11 + $0x18] sm:$0xff] }
 0x26f   :  { %2816 = vmatpush3.msra.mxu1 %v4152_v38  ;;  %v3221_v38 = vld [vmem:[%s4964_s8 + $0x1f8] sm:$0xff] }
 0x270   :  { %2817 = vmatprep.subr.mxu1 %v4164_v39 }
 0x271   :  { %2818 = vmatpush3.msra.mxu1 %v4174_v10 }
 0x272   :  { %2819 = vmatprep.subr.mxu1 %v4189_v53 }
 0x273   :  { %2820 = vmatpush3.msra.mxu1 %v4201_v1 }
 0x274   :  { %2821 = vmatprep.subr.mxu1 %v4213_v24  ;;  %v1035_v14 = vpop.f32.mrf.mxu1  ;;  %v1112_v28 = vpop.f32.mrf.mxu0  ;;  %v5052_v24 = vld [vmem:[#allocation24_spill] sm:$0xff] }
 0x275   :  { %2822 = vmatpush3.msra.mxu1 %v4227_v37  ;;  %v1036_v26 = vadd.f32 %v1035_v14, %v881_v45  ;;  %v1113_v13 = vadd.f32 %v1112_v28, %v958_v9  ;;  %v5053_v9 = vld [vmem:[#allocation25_spill] sm:$0xff]  ;;  %v5054_v37 = vld [vmem:[#allocation26_spill] sm:$0xff]  ;;  %v5055_v45 = vld [vmem:[#allocation27_spill] sm:$0xff] }
 0x276   :  { %2823 = vmatprep.subr.mxu1 %v4244_v3  ;;  %v1037_v42 = vpop.f32.mrf.mxu1  ;;  %v1114_v6 = vpop.f32.mrf.mxu0  ;;  %v5056_v3 = vld [vmem:[#allocation28_spill] sm:$0xff]  ;;  %v5074_v14 = vld [vmem:[#allocation46_spill] sm:$0xff]  ;;  %v5075_v28 = vld [vmem:[#allocation47_spill] sm:$0xff] }
 0x277   :  { %2824 = vmatpush3.msra.mxu1 %v4255_v34  ;;  %v1038_v21 = vadd.f32 %v1037_v42, %v883_v43  ;;  %v1115_v51 = vadd.f32 %v1114_v6, %v960_v2  ;;  %v4405_v31 = vadd.f32 %v1122_v46, %v1036_v26  ;;  %v4407_v15 = vadd.f32 %v1130_v57, %v1113_v13  ;;  %v5058_v34 = vld [vmem:[#allocation30_spill] sm:$0xff]  ;;  %v5069_v2 = vld [vmem:[#allocation41_spill] sm:$0xff]  ;;  %v5076_v26 = vld [vmem:[#allocation48_spill] sm:$0xff] }
 0x278   :  { %2825 = vmatprep.subr.mxu1 %v4267_v33  ;;  %v5063_v33 = vld [vmem:[#allocation35_spill] sm:$0xff]  ;;  %v5077_v13 = vld [vmem:[#allocation49_spill] sm:$0xff]  ;;  %v5078_v42 = vld [vmem:[#allocation50_spill] sm:$0xff] }
 0x279   :  { %2826 = vmatpush3.msra.mxu1 %v4277_v48  ;;  %v4400_v12 = vadd.f32 %v1126_v17, %v1038_v21  ;;  %v4402_v27 = vadd.f32 %v1134_v60, %v1115_v51  ;;  %v4422_v60 = vld [vmem:[#allocation11 + $0x30] sm:$0xff]  ;;  %v5065_v48 = vld [vmem:[#allocation37_spill] sm:$0xff] }
 0x27a   :  { %2827 = vmatprep.subr.mxu1 %v4292_v55  ;;  %v4427_v17 = vld [vmem:[#allocation11 + $0x10] sm:$0xff] }
 0x27b   :  { %2828 = vmatpush3.msra.mxu1 %v4302_v59  ;;  %1290 = vmatprep.mubr.f32.mxu1 %v4400_v12  ;;  %v5066_v55 = vld [vmem:[#allocation38_spill] sm:$0xff]  ;;  %v5068_v59 = vld [vmem:[#allocation40_spill] sm:$0xff]  ;;  %v5079_v6 = vld [vmem:[#allocation51_spill] sm:$0xff] }
 0x27c   :  { %2829 = vmatprep.subr.mxu1 %v4316_v63  ;;  %1365 = vmatprep.mubr.f32.mxu0 %v4402_v27  ;;  %v5070_v63 = vld [vmem:[#allocation42_spill] sm:$0xff] }
 0x27d   :  { %2830 = vmatpush3.msra.mxu1 %v4326_v0  ;;  %1366 = vmatmul.mubr.f32.gmra.mxu0 %v4407_v15  ;;  %v1218_v0 = vld [vmem:[#allocation11 + $0x38] sm:$0xff] }
 0x27e   :  { %1291 = vmatmul.mubr.f32.gmra.mxu1 %v4405_v31  ;;  %1441 = vmatprep.mubr.f32.mxu0 %v5051_v61 }
 0x27f   :  { %1731 = vmatprep.subr.mxu1 %v4337_v18  ;;  %1482 = vmatprep.subr.mxu0 %v1218_v0  ;;  %v5067_v18 = vld [vmem:[#allocation39_spill] sm:$0xff] }
 0x31e   :  { %v2755_v57 = vpop.f32.mrf.mxu1  ;;  %v2793_v40 = vpop.f32.mrf.mxu0 }
 0x320   :  { %v2756_v56 = vpop.f32.mrf.mxu1  ;;  %v2794_v46 = vpop.f32.mrf.mxu0 }
 0x321   :  { %v2757_v50 = vadd.f32 %v2756_v56, %v2755_v57  ;;  %v2795_v62 = vadd.f32 %v2794_v46, %v2793_v40 }
 0x323   :  { %v1363_v25 = vadd.f32 %v2795_v62, %v2757_v50 }
 0x325   :  { %2705 = vmatmul.mubr.msk.f32.vlgmr.msra.gmra.mxu0 %vm177_vm0, %v1363_v25 }
 0x326   :  { %1483 = vmatpush1.msra.mxu0 %v4422_v60  ;;  %1447 = vmatprep.mubr.f32.mxu0 %v5051_v61 }
 0x327   :  { %1484 = vmatprep.subr.mxu0 %v4424_v32 }
 0x328   :  { %1485 = vmatpush1.msra.mxu0 %v4427_v17 }
 0x329   :  { %2837 = vmatprep.subr.mxu0 %v3221_v38 }
 0x33d   :  { %v2796_v39 = vpop.f32.mrf.mxu0 }
 0x33e   :  { %v2758_v30 = vpop.f32.mrf.mxu1 }
 0x33f   :  { %v2797_v10 = vpop.f32.mrf.mxu0 }
 0x340   :  { %v2759_v44 = vpop.f32.mrf.mxu1  ;;  %v2798_v43 = vadd.f32 %v2797_v10, %v2796_v39 }
 0x341   :  { %v2760_v53 = vadd.f32 %v2759_v44, %v2758_v30 }
 0x343   :  { %v1368_v1 = vadd.f32 %v2798_v43, %v2760_v53 }
 0x345   :  { %2706 = vmatmul.mubr.msk.f32.gmra.mxu0 %vm177_vm0, %v1368_v1 }
 0x346   :  { %1518 = vmatprep.mubr.f32.mxu0 %v5051_v61 }
 0x349   :  { %2707 = vmatmul.mubr.msk.f32.vlgmr.msra.gmra.mxu0 %vm177_vm0, %v1363_v25 }
 0x34a   :  { %1524 = vmatprep.mubr.f32.mxu0 %v5051_v61  ;;  %2838 = vmatpush3.msra.mxu0 %v3945_v7  ;;  %v5059_v7 = vld [vmem:[#allocation31_spill] sm:$0xff] }
 0x34b   :  { %2839 = vmatprep.subr.mxu0 %v3958_v4  ;;  %v5060_v4 = vld [vmem:[#allocation32_spill] sm:$0xff] }
 0x34c   :  { %2840 = vmatpush3.msra.mxu0 %v3968_v8  ;;  %v5061_v8 = vld [vmem:[#allocation33_spill] sm:$0xff] }
 0x34d   :  { %2708 = vmatmul.mubr.msk.f32.gmra.mxu0 %vm177_vm0, %v1368_v1  ;;  %2841 = vmatprep.subr.mxu0 %v5052_v24 }
 0x34e   :  { %2842 = vmatpush3.msra.mxu0 %v5053_v9 }
 0x34f   :  { %2843 = vmatprep.subr.mxu0 %v5054_v37 }
 0x350   :  { %2844 = vmatpush3.msra.mxu0 %v5055_v45 }
 0x351   :  { %2845 = vmatprep.subr.mxu0 %v5056_v3 }
 0x352   :  { %2846 = vmatpush3.msra.mxu0 %v5057_v54 }
 0x353   :  { %2847 = vmatprep.subr.mxu0 %v5058_v34 }
 0x354   :  { %2848 = vmatpush3.msra.mxu0 %v5059_v7  ;;  %v2034_v7 = vld [vmem:[%s4966_s10 + $0x1f8] sm:$0xff] }
 0x355   :  { %2849 = vmatprep.subr.mxu0 %v5060_v4  ;;  %v1986_v4 = vld [vmem:[%s4966_s10 + $0x78] sm:$0xff] }
 0x356   :  { %2850 = vmatpush3.msra.mxu0 %v5061_v8  ;;  %v2001_v8 = vld [vmem:[%s4966_s10 + $0xf0] sm:$0xff] }
 0x357   :  { %2851 = vmatprep.subr.mxu0 %v5062_v36  ;;  %v2033_v36 = vld [vmem:[%s4966_s10 + $0x1f0] sm:$0xff] }
 0x358   :  { %2852 = vmatpush3.msra.mxu0 %v5063_v33  ;;  %v1985_v33 = vld [vmem:[%s4966_s10 + $0x70] sm:$0xff] }
 0x359   :  { %2853 = vmatprep.subr.mxu0 %v5064_v47  ;;  %v2017_v47 = vld [vmem:[%s4966_s10 + $0x170] sm:$0xff] }
 0x35a   :  { %2854 = vmatpush3.msra.mxu0 %v5065_v48  ;;  %v2000_v48 = vld [vmem:[%s4966_s10 + $0xe8] sm:$0xff] }
 0x35b   :  { %2855 = vmatprep.subr.mxu0 %v5066_v55  ;;  %v2032_v55 = vld [vmem:[%s4966_s10 + $0x1e8] sm:$0xff] }
 0x35c   :  { %2856 = vmatpush3.msra.mxu0 %v5067_v18  ;;  %v1984_v18 = vld [vmem:[%s4966_s10 + $0x68] sm:$0xff] }
 0x35d   :  { %2857 = vmatprep.subr.mxu0 %v5068_v59  ;;  %v2016_v59 = vld [vmem:[%s4966_s10 + $0x168] sm:$0xff] }
 0x35e   :  { %2858 = vmatpush3.msra.mxu0 %v5069_v2  ;;  %v1999_v2 = vld [vmem:[%s4966_s10 + $0xe0] sm:$0xff] }
 0x35f   :  { %2859 = vmatprep.subr.mxu0 %v5070_v63  ;;  %v2031_v63 = vld [vmem:[%s4966_s10 + $0x1e0] sm:$0xff] }
 0x360   :  { %2860 = vmatpush3.msra.mxu0 %v5071_v5  ;;  %v1983_v5 = vld [vmem:[%s4966_s10 + $0x60] sm:$0xff] }
 0x361   :  { %2861 = vmatprep.subr.mxu0 %v5072_v49  ;;  %v2015_v49 = vld [vmem:[%s4966_s10 + $0x160] sm:$0xff] }
 0x362   :  { %2862 = vmatpush3.msra.mxu0 %v5073_v19  ;;  %v1998_v19 = vld [vmem:[%s4966_s10 + $0xd8] sm:$0xff] }
 0x363   :  { %2863 = vmatprep.subr.mxu0 %v5074_v14  ;;  %v2030_v14 = vld [vmem:[%s4966_s10 + $0x1d8] sm:$0xff] }
 0x364   :  { %2864 = vmatpush3.msra.mxu0 %v5075_v28  ;;  %v1982_v28 = vld [vmem:[%s4966_s10 + $0x58] sm:$0xff] }
 0x365   :  { %2865 = vmatprep.subr.mxu0 %v5076_v26  ;;  %v2014_v26 = vld [vmem:[%s4966_s10 + $0x158] sm:$0xff] }
 0x366   :  { %2866 = vmatpush3.msra.mxu0 %v5077_v13  ;;  %v1997_v13 = vld [vmem:[%s4966_s10 + $0xd0] sm:$0xff] }
 0x367   :  { %2867 = vmatprep.subr.mxu0 %v5078_v42  ;;  %v2029_v42 = vld [vmem:[%s4966_s10 + $0x1d0] sm:$0xff] }
 0x368   :  { %2868 = vmatpush3.msra.mxu0 %v5079_v6  ;;  %v1981_v6 = vld [vmem:[%s4966_s10 + $0x50] sm:$0xff] }
 0x369   :  { %1808 = vmatprep.subr.mxu0 %v1218_v0 }
 0x3e5   :  { %v1443_v21 = vpop.f32.mrf.mxu0 }
 0x3e6   :  { %v4473_v51 = vsub.f32 %v4360_v52, %v1443_v21  ;;  %v2013_v21 = vld [vmem:[%s4966_s10 + $0x150] sm:$0xff] }
 0x3e7   :  { %v1445_v57 = vpop.f32.mrf.mxu0 }
 0x3e8   :  { %v4476_v40 = vsub.f32 %v4356_v29, %v1445_v57  ;;  %v1539_v46 = vmul.f32 %v4473_v51, %v4473_v51  ;;  %v1996_v57 = vld [vmem:[%s4966_s10 + $0xc8] sm:$0xff] }
 0x3ea   :  { %v1540_v56 = vmul.f32 %v4476_v40, %v4476_v40 }
 0x3ec   :  { %1611 = vmatprep.mubr.f32.mxu1 %v1540_v56  ;;  %v2028_v56 = vld [vmem:[%s4966_s10 + $0x1c8] sm:$0xff] }
 0x3ed   :  { %1612 = vmatmul.mubr.f32.vlgmr.msra.gmra.mxu1 %v1539_v46  ;;  %v1980_v46 = vld [vmem:[%s4966_s10 + $0x48] sm:$0xff] }
 0x3ee   :  { %1732 = vmatpush1.msra.mxu1 %v4364_v22 }
 0x3ef   :  { %1733 = vmatprep.subr.mxu1 %v4416_v35 }
 0x3f0   :  { %1734 = vmatpush1.msra.mxu1 %v4418_v41 }
 0x405   :  { %v1449_v52 = vpop.f32.mrf.mxu0 }
 0x406   :  { %v4486_v0 = vsub.f32 %v4405_v31, %v1449_v52  ;;  %v2012_v52 = vld [vmem:[%s4966_s10 + $0x148] sm:$0xff] }
 0x407   :  { %v1451_v29 = vpop.f32.mrf.mxu0 }
 0x408   :  { %v4489_v50 = vsub.f32 %v4400_v12, %v1451_v29  ;;  %v1543_v38 = vmul.f32 %v4486_v0, %v4486_v0  ;;  %v1995_v29 = vld [vmem:[%s4966_s10 + $0xc0] sm:$0xff] }
 0x409   :  { %v1520_v62 = vpop.f32.mrf.mxu0 }
 0x40a   :  { %v1544_v25 = vmul.f32 %v4489_v50, %v4489_v50  ;;  %v4496_v22 = vsub.f32 %v4362_v58, %v1520_v62  ;;  %v2027_v62 = vld [vmem:[%s4966_s10 + $0x1c0] sm:$0xff] }
 0x40b   :  { %v1522_v35 = vpop.f32.mrf.mxu0 }
 0x40c   :  { %v4499_v41 = vsub.f32 %v4358_v16, %v1522_v35  ;;  %1616 = vmatprep.mubr.f32.mxu1 %v1544_v25  ;;  %v1541_v30 = vmul.f32 %v4496_v22, %v4496_v22  ;;  %v1979_v25 = vld [vmem:[%s4966_s10 + $0x40] sm:$0xff]  ;;  %v1994_v35 = vld [vmem:[%s4966_s10 + $0xb8] sm:$0xff] }
 0x40d   :  { %v1526_v31 = vpop.f32.mrf.mxu0  ;;  %1617 = vmatmul.mubr.f32.gmra.mxu1 %v1543_v38  ;;  %v2011_v38 = vld [vmem:[%s4966_s10 + $0x140] sm:$0xff] }
 0x40e   :  { %v1542_v12 = vmul.f32 %v4499_v41, %v4499_v41  ;;  %1767 = vmatprep.mubr.f32.mxu1 %v5051_v61  ;;  %v4507_v39 = vsub.f32 %v4407_v15, %v1526_v31  ;;  %v2026_v31 = vld [vmem:[%s4966_s10 + $0x1b8] sm:$0xff] }
 0x40f   :  { %v1528_v58 = vpop.f32.mrf.mxu0 }
 0x410   :  { %v4510_v44 = vsub.f32 %v4402_v27, %v1528_v58  ;;  %1686 = vmatprep.mubr.f32.mxu0 %v1542_v12  ;;  %v1545_v10 = vmul.f32 %v4507_v39, %v4507_v39  ;;  %v1978_v12 = vld [vmem:[%s4966_s10 + $0x38] sm:$0xff]  ;;  %v1993_v58 = vld [vmem:[%s4966_s10 + $0xb0] sm:$0xff] }
 0x411   :  { %1687 = vmatmul.mubr.f32.vlgmr.msra.gmra.mxu0 %v1541_v30  ;;  %v2010_v30 = vld [vmem:[%s4966_s10 + $0x138] sm:$0xff] }
 0x412   :  { %v1546_v16 = vmul.f32 %v4510_v44, %v4510_v44  ;;  %1809 = vmatpush1.msra.mxu0 %v4422_v60 }
 0x413   :  { %1810 = vmatprep.subr.mxu0 %v4424_v32 }
 0x414   :  { %1691 = vmatprep.mubr.f32.mxu0 %v1546_v16  ;;  %1811 = vmatpush1.msra.mxu0 %v4427_v17  ;;  %v2002_v17 = vld [vmem:[%s4966_s10 + $0xf8] sm:$0xff]  ;;  %v2025_v16 = vld [vmem:[%s4966_s10 + $0x1b0] sm:$0xff] }
 0x415   :  { %1692 = vmatmul.mubr.f32.gmra.mxu0 %v1545_v10  ;;  %2875 = vmatprep.subr.mxu1 %v2002_v17  ;;  %v1977_v10 = vld [vmem:[%s4966_s10 + $0x30] sm:$0xff] }
 0x416   :  { %1844 = vmatprep.mubr.f32.mxu0 %v5051_v61  ;;  %2913 = vmatprep.subr.mxu0 %v2034_v7  ;;  %v2021_v17 = vld [vmem:[%s4966_s10 + $0x190] sm:$0xff] }
 0x417   :  { %v1973_v7 = vld [vmem:[%s4966_s10 + $0x10] sm:$0xff] }
 0x4ad   :  { %v2831_v27 = vpop.f32.mrf.mxu1 }
 0x4af   :  { %v2832_v15 = vpop.f32.mrf.mxu1 }
 0x4b0   :  { %v2833_v24 = vadd.f32 %v2832_v15, %v2831_v27  ;;  %v2009_v27 = vld [vmem:[%s4966_s10 + $0x130] sm:$0xff]  ;;  %v1992_v15 = vld [vmem:[%s4966_s10 + $0xa8] sm:$0xff] }
 0x4cd   :  { %v2834_v53 = vpop.f32.mrf.mxu1 }
 0x4cf   :  { %v2835_v37 = vpop.f32.mrf.mxu1 }
 0x4d0   :  { %v2836_v54 = vadd.f32 %v2835_v37, %v2834_v53  ;;  %v2024_v53 = vld [vmem:[%s4966_s10 + $0x1a8] sm:$0xff]  ;;  %v1975_v37 = vld [vmem:[%s4966_s10 + $0x20] sm:$0xff] }
 0x4d1   :  { %v2869_v43 = vpop.f32.mrf.mxu0 }
 0x4d3   :  { %v2870_v1 = vpop.f32.mrf.mxu0 }
 0x4d4   :  { %v2871_v9 = vadd.f32 %v2870_v1, %v2869_v43  ;;  %v1976_v43 = vld [vmem:[%s4966_s10 + $0x28] sm:$0xff] }
 0x4d5   :  { %v2872_v60 = vpop.f32.mrf.mxu0  ;;  %v2008_v1 = vld [vmem:[%s4966_s10 + $0x128] sm:$0xff] }
 0x4d6   :  { %v1689_v45 = vadd.f32 %v2871_v9, %v2833_v24  ;;  %v1991_v24 = vld [vmem:[%s4966_s10 + $0xa0] sm:$0xff] }
 0x4d7   :  { %v2873_v3 = vpop.f32.mrf.mxu0  ;;  %v2023_v9 = vld [vmem:[%s4966_s10 + $0x1a0] sm:$0xff] }
 0x4d8   :  { %v2874_v34 = vadd.f32 %v2873_v3, %v2872_v60  ;;  %2709 = vmatmul.mubr.msk.f32.vlgmr.msra.gmra.mxu1 %vm177_vm0, %v1689_v45  ;;  %2711 = vmatmul.mubr.msk.f32.vlgmr.msra.gmra.mxu0 %vm177_vm0, %v1689_v45  ;;  %v2007_v60 = vld [vmem:[%s4966_s10 + $0x120] sm:$0xff]  ;;  %v1990_v45 = vld [vmem:[%s4966_s10 + $0x98] sm:$0xff] }
 0x4d9   :  { %1773 = vmatprep.mubr.f32.mxu1 %v5051_v61  ;;  %1850 = vmatprep.mubr.f32.mxu0 %v5051_v61  ;;  %v2018_v61 = vld [vmem:[%s4966_s10 + $0x178] sm:$0xff] }
 0x4da   :  { %v1694_v32 = vadd.f32 %v2874_v34, %v2836_v54  ;;  %2876 = vmatpush3.msra.mxu1 %v1986_v4  ;;  %2914 = vmatpush3.msra.mxu0 %v2018_v61  ;;  %v2022_v3 = vld [vmem:[%s4966_s10 + $0x198] sm:$0xff]  ;;  %v2005_v4 = vld [vmem:[%s4966_s10 + $0x110] sm:$0xff]  ;;  %v1988_v61 = vld [vmem:[%s4966_s10 + $0x88] sm:$0xff] }
 0x4db   :  { %2877 = vmatprep.subr.mxu1 %v2001_v8  ;;  %2915 = vmatprep.subr.mxu0 %v2033_v36  ;;  %v1974_v54 = vld [vmem:[%s4966_s10 + $0x18] sm:$0xff]  ;;  %v2020_v8 = vld [vmem:[%s4966_s10 + $0x188] sm:$0xff] }
 0x4dc   :  { %2710 = vmatmul.mubr.msk.f32.gmra.mxu1 %vm177_vm0, %v1694_v32  ;;  %2712 = vmatmul.mubr.msk.f32.gmra.mxu0 %vm177_vm0, %v1694_v32  ;;  %v2006_v34 = vld [vmem:[%s4966_s10 + $0x118] sm:$0xff]  ;;  %v1989_v32 = vld [vmem:[%s4966_s10 + $0x90] sm:$0xff]  ;;  %v1972_v36 = vld [vmem:[%s4966_s10 + $0x8] sm:$0xff]  ;;  %vm2293_vm0 = vcmask 1043456  }
 0x4dd   :  { %2878 = vmatpush3.msra.mxu1 %v1985_v33  ;;  %2916 = vmatpush3.msra.mxu0 %v2017_v47  ;;  %v2004_v33 = vld [vmem:[%s4966_s10 + $0x108] sm:$0xff]  ;;  %v1987_v47 = vld [vmem:[%s4966_s10 + $0x80] sm:$0xff] }
 0x4de   :  { %2879 = vmatprep.subr.mxu1 %v2000_v48  ;;  %2917 = vmatprep.subr.mxu0 %v2032_v55  ;;  %v2019_v48 = vld [vmem:[%s4966_s10 + $0x180] sm:$0xff] }
 0x4df   :  { %2880 = vmatpush3.msra.mxu1 %v1984_v18  ;;  %2918 = vmatpush3.msra.mxu0 %v2016_v59  ;;  %v1971_v55 = vld [vmem:[%s4966_s10] sm:$0xff]  ;;  %v4721_v59 = vld [vmem:[%s4970_s14 + $0x78] sm:$0xff] }
 0x4e0   :  { %2881 = vmatprep.subr.mxu1 %v1999_v2  ;;  %2919 = vmatprep.subr.mxu0 %v2031_v63  ;;  %v2003_v18 = vld [vmem:[%s4966_s10 + $0x100] sm:$0xff] }
 0x4e1   :  { %2882 = vmatpush3.msra.mxu1 %v1983_v5  ;;  %2920 = vmatpush3.msra.mxu0 %v2015_v49 }
 0x4e2   :  { %2883 = vmatprep.subr.mxu1 %v1998_v19  ;;  %2921 = vmatprep.subr.mxu0 %v2030_v14 }
 0x4e3   :  { %2884 = vmatpush3.msra.mxu1 %v1982_v28  ;;  %2922 = vmatpush3.msra.mxu0 %v2014_v26 }
 0x4e4   :  { %2885 = vmatprep.subr.mxu1 %v1997_v13  ;;  %2923 = vmatprep.subr.mxu0 %v2029_v42 }
 0x4e5   :  { %2886 = vmatpush3.msra.mxu1 %v1981_v6  ;;  %2924 = vmatpush3.msra.mxu0 %v2013_v21 }
 0x4e6   :  { %2887 = vmatprep.subr.mxu1 %v1996_v57  ;;  %2925 = vmatprep.subr.mxu0 %v2028_v56 }
 0x4e7   :  { %2888 = vmatpush3.msra.mxu1 %v1980_v46  ;;  %2926 = vmatpush3.msra.mxu0 %v2012_v52 }
 0x4e8   :  { %2889 = vmatprep.subr.mxu1 %v1995_v29  ;;  %2927 = vmatprep.subr.mxu0 %v2027_v62  ;;  %v1219_v29 = vld [vmem:[#allocation8] sm:$0xf]  ;;  %v1220_v62 = vld [vmem:[#allocation10] sm:$0xf] }
 0x4e9   :  { %2890 = vmatpush3.msra.mxu1 %v1979_v25  ;;  %2928 = vmatpush3.msra.mxu0 %v2011_v38  ;;  %v1877_v25 = vrot.slane %v1219_v29, %v3605_v20 }
 0x4ea   :  { %2891 = vmatprep.subr.mxu1 %v1994_v35  ;;  %2929 = vmatprep.subr.mxu0 %v2026_v31  ;;  %v1885_v35 = vrot.slane %v1219_v29, %v4347_v11 }
 0x4eb   :  { %2892 = vmatpush3.msra.mxu1 %v1978_v12  ;;  %2930 = vmatpush3.msra.mxu0 %v2010_v30  ;;  %v5080_v30 = vld [vmem:[#allocation23_spill] sm:$0xff] }
 0x4ec   :  { %2893 = vmatprep.subr.mxu1 %v1993_v58  ;;  %2931 = vmatprep.subr.mxu0 %v2025_v16  ;;  %v1881_v58 = vrot.slane %v1219_v29, %v5080_v30  ;;  %v1906_v16 = vrot.slane %v1220_v62, %v3605_v20 }
 0x4ed   :  { %2894 = vmatpush3.msra.mxu1 %v1977_v10  ;;  %2932 = vmatpush3.msra.mxu0 %v2009_v27  ;;  %v1914_v27 = vrot.slane %v1220_v62, %v4347_v11 }
 0x4ee   :  { %2895 = vmatprep.subr.mxu1 %v1992_v15  ;;  %2933 = vmatprep.subr.mxu0 %v2024_v53  ;;  %v1889_v53 = vrot.slane %v1219_v29, %v4344_v23 }
 0x4ef   :  { %2896 = vmatpush3.msra.mxu1 %v1976_v43  ;;  %2934 = vmatpush3.msra.mxu0 %v2008_v1 }
 0x4f0   :  { %2897 = vmatprep.subr.mxu1 %v1991_v24  ;;  %2935 = vmatprep.subr.mxu0 %v2023_v9  ;;  %v1910_v9 = vrot.slane %v1220_v62, %v5080_v30 }
 0x4f1   :  { %2898 = vmatpush3.msra.mxu1 %v1975_v37  ;;  %2936 = vmatpush3.msra.mxu0 %v2007_v60 }
 0x4f2   :  { %2899 = vmatprep.subr.mxu1 %v1990_v45  ;;  %2937 = vmatprep.subr.mxu0 %v2022_v3  ;;  %v1918_v45 = vrot.slane %v1220_v62, %v4344_v23 }
 0x4f3   :  { %2900 = vmatpush3.msra.mxu1 %v1974_v54  ;;  %2938 = vmatpush3.msra.mxu0 %v2006_v34 }
 0x4f4   :  { %2901 = vmatprep.subr.mxu1 %v1989_v32  ;;  %2939 = vmatprep.subr.mxu0 %v2021_v17 }
 0x4f5   :  { %2902 = vmatpush3.msra.mxu1 %v1973_v7  ;;  %2940 = vmatpush3.msra.mxu0 %v2005_v4 }
 0x4f6   :  { %2903 = vmatprep.subr.mxu1 %v1988_v61  ;;  %2941 = vmatprep.subr.mxu0 %v2020_v8 }
 0x4f7   :  { %2904 = vmatpush3.msra.mxu1 %v1972_v36  ;;  %2942 = vmatpush3.msra.mxu0 %v2004_v33 }
 0x4f8   :  { %2905 = vmatprep.subr.mxu1 %v1987_v47  ;;  %2943 = vmatprep.subr.mxu0 %v2019_v48 }
 0x4f9   :  { %2906 = vmatpush3.msra.mxu1 %v1971_v55  ;;  %2944 = vmatpush3.msra.mxu0 %v2003_v18 }
 0x4fa   :  { %3011 = vmatprep.subr.mxu1 %v4721_v59 }
 0x598   :  { %v1769_v2 = vpop.f32.mrf.mxu1  ;;  %v1846_v63 = vpop.f32.mrf.mxu0 }
 0x599   :  { %v1770_v5 = vadd.f32 1e-05, %v1769_v2  ;;  %v1847_v49 = vadd.f32 1e-05, %v1846_v63 }
 0x59a   :  { %v1771_v19 = vpop.f32.mrf.mxu1  ;;  %v1848_v14 = vpop.f32.mrf.mxu0 }
 0x59b   :  { %3180 = vrsqrt.f32 %v1770_v5  ;;  %v1772_v28 = vadd.f32 1e-05, %v1771_v19  ;;  %v1849_v26 = vadd.f32 1e-05, %v1848_v14 }
 0x59c   :  { %3182 = vrsqrt.f32 %v1847_v49  ;;  %v1775_v13 = vpop.f32.mrf.mxu1  ;;  %v1852_v42 = vpop.f32.mrf.mxu0 }
 0x59d   :  { %3184 = vrsqrt.f32 %v1772_v28  ;;  %v1776_v6 = vadd.f32 1e-05, %v1775_v13  ;;  %v1853_v21 = vadd.f32 1e-05, %v1852_v42 }
 0x59e   :  { %3186 = vrsqrt.f32 %v1849_v26  ;;  %v1777_v57 = vpop.f32.mrf.mxu1  ;;  %v1854_v56 = vpop.f32.mrf.mxu0 }
 0x59f   :  { %3188 = vrsqrt.f32 %v1776_v6  ;;  %v1778_v46 = vadd.f32 1e-05, %v1777_v57  ;;  %v1855_v52 = vadd.f32 1e-05, %v1854_v56 }
 0x5a0   :  { %3190 = vrsqrt.f32 %v1853_v21 }
 0x5a1   :  { %3192 = vrsqrt.f32 %v1778_v46 }
 0x5a2   :  { %3194 = vrsqrt.f32 %v1855_v52 }
 0x5a8   :  { %v3181_v38 = vpop.eup %3180 }
 0x5a9   :  { %v3183_v31 = vpop.eup %3182  ;;  %v1865_v12 = vmul.f32 %v3181_v38, %v4473_v51 }
 0x5aa   :  { %v3185_v10 = vpop.eup %3184  ;;  %v1867_v15 = vmul.f32 %v3183_v31, %v4496_v22 }
 0x5ab   :  { %v3187_v43 = vpop.eup %3186  ;;  %v1894_v1 = vmul.f32 %v1877_v25, %v1865_v12  ;;  %v1866_v24 = vmul.f32 %v3185_v10, %v4476_v40 }
 0x5ac   :  { %v3189_v37 = vpop.eup %3188  ;;  %v1896_v60 = vmul.f32 %v1885_v35, %v1867_v15  ;;  %v1868_v51 = vmul.f32 %v3187_v43, %v4499_v41 }
 0x5ad   :  { %v3191_v20 = vpop.eup %3190  ;;  %v1895_v3 = vmul.f32 %v1881_v58, %v1866_v24  ;;  %v1923_v54 = vadd.f32 %v1906_v16, %v1894_v1  ;;  %v1869_v32 = vmul.f32 %v3189_v37, %v4486_v0  ;;  %v4749_v24 = vld [vmem:[%s4970_s14 + $0x68] sm:$0xff] }
 0x5ae   :  { %v3193_v11 = vpop.eup %3192  ;;  %v1897_v34 = vmul.f32 %v1889_v53, %v1868_v51  ;;  %v1925_v22 = vadd.f32 %v1914_v27, %v1896_v60  ;;  %v1871_v61 = vmul.f32 %v3191_v20, %v4507_v39  ;;  %v4757_v20 = vld [vmem:[%s4970_s14 + $0x60] sm:$0xff] }
 0x5af   :  { %v3195_v17 = vpop.eup %3194  ;;  %v1924_v7 = vadd.f32 %v1910_v9, %v1895_v3  ;;  %v1939_v4 = vmul.f32 0.70710677, %v1923_v54  ;;  %v1870_v40 = vmul.f32 %v3193_v11, %v4489_v50  ;;  %v1898_v0 = vmul.f32 %v1877_v25, %v1869_v32  ;;  %v4763_v3 = vld [vmem:[%s4970_s14 + $0x58] sm:$0xff]  ;;  %v4777_v11 = vld [vmem:[%s4970_s14 + $0x48] sm:$0xff]  ;;  %v4798_v32 = vld [vmem:[%s4970_s14 + $0x30] sm:$0xff] }
 0x5b0   :  { %v1926_v8 = vadd.f32 %v1918_v45, %v1897_v34  ;;  %v1941_v36 = vmul.f32 0.70710677, %v1925_v22  ;;  %v1872_v41 = vmul.f32 %v3195_v17, %v4510_v44  ;;  %v1900_v18 = vmul.f32 %v1885_v35, %v1871_v61  ;;  %v4784_v34 = vld [vmem:[%s4970_s14 + $0x40] sm:$0xff]  ;;  %v4807_v17 = vld [vmem:[%s4970_s14 + $0x28] sm:$0xff] }
 0x5b1   :  { %v1940_v23 = vmul.f32 0.70710677, %v1924_v7  ;;  %3196 = verf.f32 %v1939_v4  ;;  %v1899_v33 = vmul.f32 %v1881_v58, %v1870_v40  ;;  %v1927_v50 = vadd.f32 %v1906_v16, %v1898_v0  ;;  %v4743_v58 = vld [vmem:[%s4970_s14 + $0x70] sm:$0xff]  ;;  %v4819_v4 = vld [vmem:[%s4970_s14 + $0x18] sm:$0xff]  ;;  %v4833_v61 = vld [vmem:[%s4970_s14 + $0x8] sm:$0xff] }
 0x5b2   :  { %v1942_v47 = vmul.f32 0.70710677, %v1926_v8  ;;  %3198 = verf.f32 %v1941_v36  ;;  %v1901_v48 = vmul.f32 %v1889_v53, %v1872_v41  ;;  %v1929_v5 = vadd.f32 %v1914_v27, %v1900_v18  ;;  %v4828_v40 = vld [vmem:[%s4970_s14 + $0x10] sm:$0xff]  ;;  %v2208_v36 = vld [vmem:[%s4971_s15] sm:$0xf] }
 0x5b3   :  { %3200 = verf.f32 %v1940_v23  ;;  %v1928_v55 = vadd.f32 %v1910_v9, %v1899_v33  ;;  %v1943_v49 = vmul.f32 0.70710677, %v1927_v50  ;;  %v1932_v42 = vmul.f32 0.5, %v1924_v7  ;;  %v4814_v7 = vld [vmem:[%s4970_s14 + $0x20] sm:$0xff]  ;;  %3046 = vmatprep.subr.msk.mxu0 %vm2293_vm0, %v2208_v36  ;;  %v2713_v33 = vld [vmem:[#allocation13] ss:$0 sm:$0xff] }
 0x5b4   :  { %3202 = verf.f32 %v1942_v47  ;;  %v1930_v2 = vadd.f32 %v1918_v45, %v1901_v48  ;;  %v1945_v44 = vmul.f32 0.70710677, %v1929_v5  ;;  %v1934_v57 = vmul.f32 0.5, %v1926_v8  ;;  %v4840_v8 = vld [vmem:[%s4970_s14] sm:$0xff] }
 0x5b5   :  { %v1944_v63 = vmul.f32 0.70710677, %v1928_v55  ;;  %v1931_v46 = vmul.f32 0.5, %v1923_v54  ;;  %v1933_v29 = vmul.f32 0.5, %v1925_v22  ;;  %v1936_v12 = vmul.f32 0.5, %v1928_v55  ;;  %v4770_v54 = vld [vmem:[%s4970_s14 + $0x50] sm:$0xff] }
 0x5b6   :  { %v1946_v39 = vmul.f32 0.70710677, %v1930_v2  ;;  %v1938_v10 = vmul.f32 0.5, %v1930_v2  ;;  %v1935_v43 = vmul.f32 0.5, %v1927_v50  ;;  %v1937_v37 = vmul.f32 0.5, %v1929_v5  ;;  %v4791_v22 = vld [vmem:[%s4970_s14 + $0x38] sm:$0xff] }
 0x5b7   :  { %3204 = verf.f32 %v1944_v63 }
 0x5b8   :  { %3206 = verf.f32 %v1946_v39 }
 0x5b9   :  { %3208 = verf.f32 %v1943_v49 }
 0x5ba   :  { %3210 = verf.f32 %v1945_v44 }
 0x5be   :  { %v3197_v19 = vpop.eup %3196 }
 0x5bf   :  { %v3199_v14 = vpop.eup %3198  ;;  %v1955_v26 = vadd.f32 1.0, %v3197_v19 }
 0x5c0   :  { %v3201_v28 = vpop.eup %3200  ;;  %v1957_v21 = vadd.f32 1.0, %v3199_v14 }
 0x5c1   :  { %v3203_v13 = vpop.eup %3202  ;;  %v1956_v6 = vadd.f32 1.0, %v3201_v28  ;;  %v1963_v38 = vmul.f32 %v1955_v26, %v1931_v46 }
 0x5c2   :  { %v1958_v56 = vadd.f32 1.0, %v3203_v13  ;;  %v1965_v31 = vmul.f32 %v1957_v21, %v1933_v29  ;;  %v2576_v29 = vld [vmem:[%s4972_s16 + $0x70] sm:$0xff] }
 0x5c3   :  { %v1964_v52 = vmul.f32 %v1956_v6, %v1932_v42 }
 0x5c4   :  { %v3205_v62 = vpop.eup %3204  ;;  %v1966_v25 = vmul.f32 %v1958_v56, %v1934_v57 }
 0x5c5   :  { %v3207_v35 = vpop.eup %3206  ;;  %2106 = vmatprep.mubr.f32.mxu1 %v1964_v52  ;;  %v1960_v30 = vadd.f32 1.0, %v3205_v62  ;;  %v2577_v52 = vld [vmem:[%s4972_s16 + $0x78] sm:$0xff]  ;;  %v2575_v62 = vld [vmem:[%s4972_s16 + $0x68] sm:$0xff] }
 0x5c6   :  { %v3209_v16 = vpop.eup %3208  ;;  %2181 = vmatprep.mubr.f32.mxu0 %v1966_v25  ;;  %2107 = vmatmul.mubr.f32.vlgmr.msra.gmra.mxu1 %v1963_v38  ;;  %v1962_v27 = vadd.f32 1.0, %v3207_v35  ;;  %v2574_v25 = vld [vmem:[%s4972_s16 + $0x60] sm:$0xff]  ;;  %v2573_v38 = vld [vmem:[%s4972_s16 + $0x58] sm:$0xff]  ;;  %v2572_v35 = vld [vmem:[%s4972_s16 + $0x50] sm:$0xff] }
 0x5c7   :  { %v3211_v15 = vpop.eup %3210  ;;  %2182 = vmatmul.mubr.f32.vlgmr.msra.gmra.mxu0 %v1965_v31  ;;  %v1968_v53 = vmul.f32 %v1960_v30, %v1936_v12  ;;  %v1959_v1 = vadd.f32 1.0, %v3209_v16  ;;  %3012 = vmatpush3.msra.mxu1 %v4721_v59  ;;  %v2571_v31 = vld [vmem:[%s4972_s16 + $0x48] sm:$0xff]  ;;  %v2570_v12 = vld [vmem:[%s4972_s16 + $0x40] sm:$0xff]  ;;  %v2569_v30 = vld [vmem:[%s4972_s16 + $0x38] sm:$0xff] }
 0x5c8   :  { %v1970_v9 = vmul.f32 %v1962_v27, %v1938_v10  ;;  %v1961_v60 = vadd.f32 1.0, %v3211_v15  ;;  %3013 = vmatprep.subr.mxu1 %v4743_v58  ;;  %3047 = vmatpush3.msk.msra.mxu0 %vm2293_vm0, %v2208_v36  ;;  %v2567_v16 = vld [vmem:[%s4972_s16 + $0x28] sm:$0xff]  ;;  %v2566_v10 = vld [vmem:[%s4972_s16 + $0x20] sm:$0xff]  ;;  %v2565_v27 = vld [vmem:[%s4972_s16 + $0x18] sm:$0xff] }
 0x5c9   :  { %2111 = vmatprep.mubr.f32.mxu1 %v1968_v53  ;;  %v1967_v51 = vmul.f32 %v1959_v1, %v1935_v43  ;;  %3014 = vmatpush3.msra.mxu1 %v4743_v58  ;;  %v2564_v15 = vld [vmem:[%s4972_s16 + $0x10] sm:$0xff]  ;;  %v2563_v53 = vld [vmem:[%s4972_s16 + $0x8] sm:$0xff]  ;;  %v2562_v43 = vld [vmem:[%s4972_s16] sm:$0xff] }
 0x5ca   :  { %2186 = vmatprep.mubr.f32.mxu0 %v1970_v9  ;;  %v1969_v45 = vmul.f32 %v1961_v60, %v1937_v37  ;;  %3015 = vmatprep.subr.mxu1 %v4749_v24 }
 0x5cb   :  { %2112 = vmatmul.mubr.f32.gmra.mxu1 %v1967_v51  ;;  %3051 = vmatprep.subr.mxu0 %v4721_v59  ;;  %v2720_v51 = vld [vmem:[%s4968_s12] ss:$0 sm:$0xff] }
 0x5cc   :  { %2187 = vmatmul.mubr.f32.gmra.mxu0 %v1969_v45  ;;  %3016 = vmatpush3.msra.mxu1 %v4749_v24 }
 0x5cd   :  { %3017 = vmatprep.subr.mxu1 %v4757_v20 }
 0x5ce   :  { %3018 = vmatpush3.msra.mxu1 %v4757_v20 }
 0x5cf   :  { %3019 = vmatprep.subr.mxu1 %v4763_v3 }
 0x5d0   :  { %3020 = vmatpush3.msra.mxu1 %v4763_v3 }
 0x5d1   :  { %3021 = vmatprep.subr.mxu1 %v4770_v54 }
 0x5d2   :  { %3022 = vmatpush3.msra.mxu1 %v4770_v54 }
 0x5d3   :  { %3023 = vmatprep.subr.mxu1 %v4777_v11 }
 0x5d4   :  { %3024 = vmatpush3.msra.mxu1 %v4777_v11 }
 0x5d5   :  { %3025 = vmatprep.subr.mxu1 %v4784_v34 }
 0x5d6   :  { %3026 = vmatpush3.msra.mxu1 %v4784_v34 }
 0x5d7   :  { %3027 = vmatprep.subr.mxu1 %v4791_v22 }
 0x5d8   :  { %3028 = vmatpush3.msra.mxu1 %v4791_v22 }
 0x5d9   :  { %3029 = vmatprep.subr.mxu1 %v4798_v32 }
 0x5da   :  { %3030 = vmatpush3.msra.mxu1 %v4798_v32 }
 0x5db   :  { %3031 = vmatprep.subr.mxu1 %v4807_v17 }
 0x5dc   :  { %3032 = vmatpush3.msra.mxu1 %v4807_v17 }
 0x5dd   :  { %3033 = vmatprep.subr.mxu1 %v4814_v7 }
 0x5de   :  { %3034 = vmatpush3.msra.mxu1 %v4814_v7 }
 0x5df   :  { %3035 = vmatprep.subr.mxu1 %v4819_v4 }
 0x5e0   :  { %3036 = vmatpush3.msra.mxu1 %v4819_v4 }
 0x5e1   :  { %3037 = vmatprep.subr.mxu1 %v4828_v40 }
 0x5e2   :  { %3038 = vmatpush3.msra.mxu1 %v4828_v40 }
 0x5e3   :  { %3039 = vmatprep.subr.mxu1 %v4833_v61 }
 0x5e4   :  { %3040 = vmatpush3.msra.mxu1 %v4833_v61 }
 0x5e5   :  { %3041 = vmatprep.subr.mxu1 %v4840_v8 }
 0x5e6   :  { %3042 = vmatpush3.msra.mxu1 %v4840_v8 }
 0x5e7   :  { %3086 = vmatprep.subr.msk.mxu1 %vm2293_vm0, %v2208_v36 }
 0x686   :  { %v2907_v41 = vpop.f32.mrf.mxu1 }
 0x687   :  { %v2945_v23 = vpop.f32.mrf.mxu0 }
 0x688   :  { %v2908_v47 = vpop.f32.mrf.mxu1 }
 0x689   :  { %v2909_v48 = vadd.f32 %v2908_v47, %v2907_v41  ;;  %v2946_v55 = vpop.f32.mrf.mxu0  ;;  %v2722_v47 = vld [vmem:[%s4973_s17] ss:$0 sm:$0xff] }
 0x68a   :  { %v2947_v18 = vadd.f32 %v2946_v55, %v2945_v23 }
 0x68b   :  { %v2109_v0 = vadd.f32 %v2909_v48, %v2713_v33  ;;  %v2910_v2 = vpop.f32.mrf.mxu1 }
 0x68c   :  { %v2948_v63 = vpop.f32.mrf.mxu0 }
 0x68d   :  { %v2184_v50 = vadd.f32 %v2947_v18, %v2109_v0  ;;  %v2911_v5 = vpop.f32.mrf.mxu1 }
 0x68e   :  { %v2912_v39 = vadd.f32 %v2911_v5, %v2910_v2  ;;  %v2949_v49 = vpop.f32.mrf.mxu0 }
 0x68f   :  { %3043 = vmatprep.mubr.f32.mxu1 %v2184_v50  ;;  %v2950_v19 = vadd.f32 %v2949_v49, %v2948_v63 }
 0x690   :  { %v2114_v44 = vadd.f32 %v2912_v39, %v2713_v33 }
 0x692   :  { %v2189_v14 = vadd.f32 %v2950_v19, %v2114_v44 }
 0x694   :  { %3044 = vmatmul.mubr.f32.vlgmr.msra.gmra.mxu1 %v2189_v14 }
 0x695   :  { %3087 = vmatpush3.msk.msra.mxu1 %vm2293_vm0, %v2208_v36 }
 0x696   :  { %3091 = vmatprep.subr.mxu1 %v2577_v52 }
 0x754   :  { %v3045_v28 = vpop.f32.mrf.mxu1 }
 0x756   :  { %v2277_v26 = vpop.f32.mrf.mxu1 }
 0x757   :  { %3048 = vmatprep.mubr.msk.f32.mxu0 %vm2286_vm8, %v2277_v26 }
 0x758   :  { %3049 = vmatmul.mubr.msk.f32.vlgmr.msra.gmra.mxu0 %vm2286_vm8, %v3045_v28 }
 0x759   :  { %3052 = vmatpush3.msra.mxu0 %v4721_v59 }
 0x75a   :  { %3053 = vmatprep.subr.mxu0 %v4743_v58 }
 0x75b   :  { %3054 = vmatpush3.msra.mxu0 %v4743_v58  ;;  %v2568_v58 = vld [vmem:[%s4972_s16 + $0x30] sm:$0xff] }
 0x75c   :  { %3055 = vmatprep.subr.mxu0 %v4749_v24 }
 0x75d   :  { %3056 = vmatpush3.msra.mxu0 %v4749_v24 }
 0x75e   :  { %3057 = vmatprep.subr.mxu0 %v4757_v20 }
 0x75f   :  { %3058 = vmatpush3.msra.mxu0 %v4757_v20 }
 0x760   :  { %3059 = vmatprep.subr.mxu0 %v4763_v3 }
 0x761   :  { %3060 = vmatpush3.msra.mxu0 %v4763_v3  ;;  %v2721_v3 = vld [vmem:[#allocation14] ss:$0 sm:$0xff] }
 0x762   :  { %3061 = vmatprep.subr.mxu0 %v4770_v54 }
 0x763   :  { %3062 = vmatpush3.msra.mxu0 %v4770_v54 }
 0x764   :  { %3063 = vmatprep.subr.mxu0 %v4777_v11 }
 0x765   :  { %3064 = vmatpush3.msra.mxu0 %v4777_v11 }
 0x766   :  { %3065 = vmatprep.subr.mxu0 %v4784_v34 }
 0x767   :  { %3066 = vmatpush3.msra.mxu0 %v4784_v34 }
 0x768   :  { %3067 = vmatprep.subr.mxu0 %v4791_v22 }
 0x769   :  { %3068 = vmatpush3.msra.mxu0 %v4791_v22 }
 0x76a   :  { %3069 = vmatprep.subr.mxu0 %v4798_v32 }
 0x76b   :  { %3070 = vmatpush3.msra.mxu0 %v4798_v32 }
 0x76c   :  { %3071 = vmatprep.subr.mxu0 %v4807_v17 }
 0x76d   :  { %3072 = vmatpush3.msra.mxu0 %v4807_v17 }
 0x76e   :  { %3073 = vmatprep.subr.mxu0 %v4814_v7 }
 0x76f   :  { %3074 = vmatpush3.msra.mxu0 %v4814_v7 }
 0x770   :  { %3075 = vmatprep.subr.mxu0 %v4819_v4 }
 0x771   :  { %3076 = vmatpush3.msra.mxu0 %v4819_v4 }
 0x772   :  { %3077 = vmatprep.subr.mxu0 %v4828_v40 }
 0x773   :  { %3078 = vmatpush3.msra.mxu0 %v4828_v40 }
 0x774   :  { %3079 = vmatprep.subr.mxu0 %v4833_v61 }
 0x775   :  { %3080 = vmatpush3.msra.mxu0 %v4833_v61 }
 0x776   :  { %3081 = vmatprep.subr.mxu0 %v4840_v8 }
 0x777   :  { %3082 = vmatpush3.msra.mxu0 %v4840_v8 }
 0x818   :  { %v3050_v59 = vpop.f32.mrf.mxu0 }
 0x819   :  { %v4887_v13 = vsub.f32 %v2189_v14, %v3050_v59 }
 0x81a   :  { %v2363_v42 = vpop.f32.mrf.mxu0 }
 0x81b   :  { %v4889_v6 = vsub.f32 %v2184_v50, %v2363_v42  ;;  %v2375_v57 = vmul.f32 %v4887_v13, %v4887_v13 }
 0x81d   :  { %v2374_v21 = vmul.f32 %v4889_v6, %v4889_v6 }
 0x81f   :  { %3083 = vmatprep.mubr.f32.mxu0 %v2374_v21 }
 0x820   :  { %3084 = vmatmul.mubr.f32.vlgmr.msra.gmra.mxu0 %v2375_v57 }
 0x8e0   :  { %v3085_v56 = vpop.f32.mrf.mxu0 }
 0x8e2   :  { %v2442_v46 = vpop.f32.mrf.mxu0 }
 0x8e3   :  { %3088 = vmatprep.mubr.msk.f32.mxu1 %vm2286_vm8, %v2442_v46 }
 0x8e4   :  { %3089 = vmatmul.mubr.msk.f32.vlgmr.msra.gmra.mxu1 %vm2286_vm8, %v3085_v56 }
 0x8e5   :  { %3092 = vmatpush3.msra.mxu1 %v2577_v52 }
 0x8e6   :  { %3093 = vmatprep.subr.mxu1 %v2576_v29 }
 0x8e7   :  { %3094 = vmatpush3.msra.mxu1 %v2576_v29 }
 0x8e8   :  { %3095 = vmatprep.subr.mxu1 %v2575_v62 }
 0x8e9   :  { %3096 = vmatpush3.msra.mxu1 %v2575_v62 }
 0x8ea   :  { %3097 = vmatprep.subr.mxu1 %v2574_v25 }
 0x8eb   :  { %3098 = vmatpush3.msra.mxu1 %v2574_v25 }
 0x8ec   :  { %3099 = vmatprep.subr.mxu1 %v2573_v38 }
 0x8ed   :  { %3100 = vmatpush3.msra.mxu1 %v2573_v38 }
 0x8ee   :  { %3101 = vmatprep.subr.mxu1 %v2572_v35 }
 0x8ef   :  { %3102 = vmatpush3.msra.mxu1 %v2572_v35 }
 0x8f0   :  { %3103 = vmatprep.subr.mxu1 %v2571_v31 }
 0x8f1   :  { %3104 = vmatpush3.msra.mxu1 %v2571_v31 }
 0x8f2   :  { %3105 = vmatprep.subr.mxu1 %v2570_v12 }
 0x8f3   :  { %3106 = vmatpush3.msra.mxu1 %v2570_v12 }
 0x8f4   :  { %3107 = vmatprep.subr.mxu1 %v2569_v30 }
 0x8f5   :  { %3108 = vmatpush3.msra.mxu1 %v2569_v30 }
 0x8f6   :  { %3109 = vmatprep.subr.mxu1 %v2568_v58 }
 0x8f7   :  { %3110 = vmatpush3.msra.mxu1 %v2568_v58 }
 0x8f8   :  { %3111 = vmatprep.subr.mxu1 %v2567_v16 }
 0x8f9   :  { %3112 = vmatpush3.msra.mxu1 %v2567_v16 }
 0x8fa   :  { %3113 = vmatprep.subr.mxu1 %v2566_v10 }
 0x8fb   :  { %3114 = vmatpush3.msra.mxu1 %v2566_v10 }
 0x8fc   :  { %3115 = vmatprep.subr.mxu1 %v2565_v27 }
 0x8fd   :  { %3116 = vmatpush3.msra.mxu1 %v2565_v27 }
 0x8fe   :  { %3117 = vmatprep.subr.mxu1 %v2564_v15 }
 0x8ff   :  { %3118 = vmatpush3.msra.mxu1 %v2564_v15 }
 0x900   :  { %3119 = vmatprep.subr.mxu1 %v2563_v53 }
 0x901   :  { %3120 = vmatpush3.msra.mxu1 %v2563_v53 }
 0x902   :  { %3121 = vmatprep.subr.mxu1 %v2562_v43 }
 0x903   :  { %3122 = vmatpush3.msra.mxu1 %v2562_v43 }
 0x9a4   :  { %v3090_v1 = vpop.f32.mrf.mxu1 }
 0x9a5   :  { %v2529_v24 = vadd.f32 1e-05, %v3090_v1 }
 0x9a6   :  { %v2523_v9 = vpop.f32.mrf.mxu1 }
 0x9a7   :  { %3212 = vrsqrt.f32 %v2529_v24  ;;  %v2524_v37 = vadd.f32 1e-05, %v2523_v9 }
 0x9a9   :  { %3214 = vrsqrt.f32 %v2524_v37 }
 0x9b4   :  { %v3213_v60 = vpop.eup %3212 }
 0x9b5   :  { %v2535_v45 = vmul.f32 %v3213_v60, %v4887_v13 }
 0x9b6   :  { %v3215_v20 = vpop.eup %3214 }
 0x9b7   :  { %v2534_v54 = vmul.f32 %v3215_v20, %v4889_v6  ;;  %v2543_v11 = vmul.f32 %v2720_v51, %v2535_v45 }
 0x9b9   :  { %v2542_v34 = vmul.f32 %v2720_v51, %v2534_v54  ;;  %v2551_v22 = vadd.f32 %v2721_v3, %v2543_v11 }
 0x9bb   :  { %v2550_v32 = vadd.f32 %v2721_v3, %v2542_v34  ;;  %v2555_v17 = vmul.f32 0.70710677, %v2551_v22  ;;  %v2553_v41 = vmul.f32 0.5, %v2551_v22 }
 0x9bd   :  { %v2554_v7 = vmul.f32 0.70710677, %v2550_v32  ;;  %3216 = verf.f32 %v2555_v17  ;;  %v2552_v8 = vmul.f32 0.5, %v2550_v32 }
 0x9bf   :  { %3218 = verf.f32 %v2554_v7 }
 0x9ca   :  { %v3217_v4 = vpop.eup %3216 }
 0x9cb   :  { %v2559_v61 = vadd.f32 1.0, %v3217_v4 }
 0x9cc   :  { %v3219_v40 = vpop.eup %3218 }
 0x9cd   :  { %v2558_v36 = vadd.f32 1.0, %v3219_v40  ;;  %v2561_v33 = vmul.f32 %v2559_v61, %v2553_v41 }
 0x9cf   :  { %v2560_v23 = vmul.f32 %v2558_v36, %v2552_v8 }
 0x9d1   :  { %3123 = vmatprep.mubr.f32.mxu1 %v2560_v23 }
 0x9d2   :  { %3124 = vmatmul.mubr.f32.vlgmr.msra.gmra.mxu1 %v2561_v33 }
 0xa92   :  { %v3125_v48 = vpop.f32.mrf.mxu1 }
 0xa93   :  { %v2657_v55 = vadd.f32 %v3125_v48, %v2722_v47 }
 0xa94   :  { %v2651_v0 = vpop.f32.mrf.mxu1 }
 0xa95   :  { %2661 = vst [vmem:[#allocation16 + $0x8] sm:$0xff] %v2657_v55  ;;  %v2652_v18 = vadd.f32 %v2722_v47, %v2651_v0 }
 0xa97   :  { %2660 = vst [vmem:[#allocation16] sm:$0xff] %v2652_v18 }
 0xa98   :  { %3393 = shalt.err (!%p3390_p2)
}
 0xa99   :  { %s3434_s8 = smov 128   ;;  %s3435_s11 = smov 8  }
 0xa9a   :  { %2673 = dma.vmem_to_hbm [thread:$0]  %s2668_s5, 256, %s4974_s18, [#allocation4], %s3434_s8, %s3434_s8, %s3435_s11  }
 0xa9b   :  { %3412 = dma.done.wait [#allocation4], 256  }
 0xa9c   :  { %3413 = vsyncadd [#allocation4], 4294967040 }
 0xa9d   :  { %2677 = vsyncpa [#allocation3], 1 }
 0xa9e   :  { %2678 = vsyncpa [#allocation6], 1 }
 0xa9f   :  { %2679 = vsyncpa [#allocation9], 1 }
 0xaa0   :  { %2680 = vsyncpa [#allocation12], 1 }
 0xaa1   :  { %2681 = vsyncpa [#allocation15], 1 }
 0xaa2   :  { %2682 = vsyncpa [#allocation4], 1 }

</bundles_post_ra>
